<compile_context>
chip_gen: v5e
topology: v5e:2x2
jax: 0.10.0
libtpu: 0.0.40
codegen_flags: <defaults>
</compile_context>

<pallas_src>
import functools

import jax
import jax.numpy as jnp
from jax import lax
from jax.experimental import pallas as pl
from jax.experimental.pallas import tpu as pltpu

LEAKY_SLOPE = 0.01   # nn.LeakyReLU default negative_slope
BN_EPS = 1e-5        # nn.BatchNorm2d default eps


def _round_up(x, m):
    return (x + m - 1) // m * m


def _fill_halo(pad_ref, interior, hp, wp):
    """Write `interior` into pad_ref[:, 1:hp+1, 1:wp+1, :]; zero the 1-px border.

    Only the border is re-zeroed each grid step (the interior is fully
    overwritten); columns >= wp+2 of the sublane-tile-padded scratch are never
    read by any conv tap, so they stay untouched.  Re-zeroing every step keeps
    the 'parallel' grid axis safe under megacore sharding.
    """
    nb, _, wpad, c = pad_ref.shape
    zrow = jnp.zeros((nb, 1, wpad, c), jnp.float32)
    pad_ref[:, 0:1, :, :] = zrow
    pad_ref[:, hp + 1:hp + 2, :, :] = zrow
    zcol = jnp.zeros((nb, hp + 2, 1, c), jnp.float32)
    pad_ref[:, :, 0:1, :] = zcol
    pad_ref[:, :, wp + 1:wp + 2, :] = zcol
    pad_ref[:, 1:hp + 1, 1:wp + 1, :] = interior


def _conv3x3(pad_ref, w_ref, hp, wp):
    """3x3 'SAME' conv as 9 accumulating MXU dots over the true channel count.

    Each (dy, dx) tap reads its shifted window of the halo scratch directly; no
    im2col patch matrix is materialized and the contraction carries no all-zero
    rows.  MXU FLOPs equal a single K=9*C dot; the extra pushes are negligible
    next to the input DMA for this memory-bound block.
    # TODO(synk): on v7x only, fp8 operands (f32 accumulation) for these dots
    # once a configuration is actually MXU-bound.
    """
    nb, _, _, c_in = pad_ref.shape
    m = nb * hp * wp
    acc = None
    for dy in range(3):
        for dx in range(3):
            lhs = pad_ref[:, dy:dy + hp, dx:dx + wp, :].reshape(m, c_in)
            part = jnp.dot(lhs, w_ref[dy, dx], preferred_element_type=jnp.float32)
            acc = part if acc is None else acc + part
    return acc   # (m, c_out) f32


def _down_block_kernel(x_ref, w1_ref, t1_ref, w2_ref, t2_ref, o_ref,
                       pad1_ref, pad2_ref, *, nb, hp, wp, c_out):
    # ---------------- MaxPool2d(kernel=2, stride=2) ----------------
    # The 2x2 window lives in the leading (size-4) axis of the host-transposed
    # input, so pooling is four aligned reads + elementwise max (no relayouts).
    pooled = jnp.maximum(jnp.maximum(x_ref[0], x_ref[1]),
                         jnp.maximum(x_ref[2], x_ref[3]))      # (nb,hp,wp,C) f32

    # ------------- conv1 (3x3, pad=1) + BN(eval) + LeakyReLU -------------
    _fill_halo(pad1_ref, pooled, hp, wp)
    h = _conv3x3(pad1_ref, w1_ref, hp, wp) + t1_ref[...]       # bias+BN folded shift
    h = jnp.where(h > 0, h, LEAKY_SLOPE * h)
    # nn.Dropout is the identity in eval mode.
    # TODO(synk): training-mode Dropout / batch-statistics BatchNorm not implemented.

    # ------------- conv2 (3x3, pad=1) + BN(eval) + LeakyReLU -------------
    _fill_halo(pad2_ref, h.reshape(nb, hp, wp, c_out), hp, wp)
    h2 = _conv3x3(pad2_ref, w2_ref, hp, wp) + t2_ref[...]
    h2 = jnp.where(h2 > 0, h2, LEAKY_SLOPE * h2)

    o_ref[...] = h2.reshape(nb, hp, wp, c_out)


def _fold_conv_bn(w_oihw, bias, gamma, beta, mean, var):
    """Fold eval-mode BatchNorm (and the conv bias) into the conv weights / shift.

    Returns:
      weights: (3, 3, Cin, Cout) f32 with the BN scale folded per output channel.
      shift:   (1, Cout) f32 = (bias - running_mean) * scale + beta.
    """
    scale = gamma / jnp.sqrt(var + BN_EPS)                     # (O,)
    shift = (bias - mean) * scale + beta                       # (O,)
    w = jnp.transpose(w_oihw, (2, 3, 1, 0)) * scale            # (3,3,I,O) * scale[o]
    return w.astype(jnp.float32), shift.reshape(1, -1).astype(jnp.float32)


def down_block_forward(x_nchw, params):
    N, C, H, W = x_nchw.shape
    assert H % 2 == 0 and W % 2 == 0, "MaxPool2d(2) path assumes even H and W"
    c_out = params["w1"].shape[0]
    hp, wp = H // 2, W // 2

    # Single host transpose (the NCHW -> channels-last move we need anyway) that
    # also exposes the 2x2 pool window as a leading axis of size 4.  No channel
    # padding and no dtype cast: the kernel DMAs exactly the real data.
    x_pool = x_nchw.reshape(N, C, hp, 2, wp, 2)
    x_pool = jnp.transpose(x_pool, (3, 5, 0, 2, 4, 1))         # (2,2,N,hp,wp,C)
    x_pool = x_pool.reshape(4, N, hp, wp, C)

    w1, t1 = _fold_conv_bn(params["w1"], params["b1"], params["g1"],
                           params["be1"], params["m1"], params["v1"])
    w2, t2 = _fold_conv_bn(params["w2"], params["b2"], params["g2"],
                           params["be2"], params["m2"], params["v2"])

    # Group images per grid step so the matmul M dim (nb*hp*wp) approaches 256
    # (256-wide v6e/v7x MXU; v5e's 128-wide saturates earlier), but never
    # collapse the grid below 2 steps: that would idle one of v7x's two
    # TensorCores and leave the input DMA un-pipelined.
    m_target = 256
    nb = 1 if hp * wp >= m_target else max(1, min(N, m_target // (hp * wp)))
    while nb > 1 and (N % nb != 0 or N // nb < 2):
        nb -= 1

    # Halo scratch: W extent padded to the f32 sublane tile (8); the padded
    # columns are never read, only the 1-px border is zeroed per step.
    wpad = _round_up(wp + 2, 8)

    # TODO(synk): for large images add an H-strip "parallel" grid axis (1-row
    # halo) and size the strips against v7x's 64 MiB VMEM (double-buffered
    # input/output blocks + both halo scratches under ~48 MiB), not v6e's 128.

    kernel = functools.partial(_down_block_kernel,
                               nb=nb, hp=hp, wp=wp, c_out=c_out)

    out_nhwc = pl.pallas_call(
        kernel,
        out_shape=jax.ShapeDtypeStruct((N, hp, wp, c_out), jnp.float32),
        grid_spec=pltpu.PrefetchScalarGridSpec(
            num_scalar_prefetch=0,
            grid=(N // nb,),
            in_specs=[
                pl.BlockSpec((4, nb, hp, wp, C), lambda n: (0, n, 0, 0, 0)),
                # Weights/shifts are grid-invariant and tiny (~3 KB total), so
                # default double-buffering costs nothing (Buffered(1) omitted).
                pl.BlockSpec((3, 3, C, c_out), lambda n: (0, 0, 0, 0)),
                pl.BlockSpec((1, c_out), lambda n: (0, 0)),
                pl.BlockSpec((3, 3, c_out, c_out), lambda n: (0, 0, 0, 0)),
                pl.BlockSpec((1, c_out), lambda n: (0, 0)),
            ],
            out_specs=pl.BlockSpec((nb, hp, wp, c_out), lambda n: (n, 0, 0, 0)),
            scratch_shapes=[
                pltpu.VMEM((nb, hp + 2, wpad, C), jnp.float32),      # conv1 halo
                pltpu.VMEM((nb, hp + 2, wpad, c_out), jnp.float32),  # conv2 halo
            ],
        ),
        compiler_params=pltpu.CompilerParams(
            dimension_semantics=("parallel",),
            # Far more than this kernel needs (<1 MiB of blocks + scratch); kept
            # explicit as the budget knob for the future H-strip tiling.
            vmem_limit_bytes=32 * 1024 * 1024,
        ),
    )(x_pool, w1, t1, w2, t2)

    # True-c_out NHWC -> NCHW (no channel-padding slice needed).
    return jnp.transpose(out_nhwc, (0, 3, 1, 2))


def down_block_reference(x, p):
    """Pure-JAX reference (eval-mode), NCHW, for numerical verification."""
    pooled = lax.reduce_window(x, -jnp.inf, lax.max, (1, 1, 2, 2), (1, 1, 2, 2), "VALID")

    def conv_bn_lrelu(h, w, bconv, gamma, beta, mean, var):
        h = lax.conv_general_dilated(h, w, (1, 1), "SAME",
                                     dimension_numbers=("NCHW", "OIHW", "NCHW"))
        h = h + bconv[None, :, None, None]
        h = (h - mean[None, :, None, None]) / jnp.sqrt(var[None, :, None, None] + BN_EPS)
        h = h * gamma[None, :, None, None] + beta[None, :, None, None]
        return jnp.where(h > 0, h, LEAKY_SLOPE * h)

    h = conv_bn_lrelu(pooled, p["w1"], p["b1"], p["g1"], p["be1"], p["m1"], p["v1"])
    h = conv_bn_lrelu(h, p["w2"], p["b2"], p["g2"], p["be2"], p["m2"], p["v2"])
    return h


if __name__ == "__main__":
    key = jax.random.PRNGKey(0)
    N, C_IN, C_OUT, H, W = 2, 4, 8, 16, 16
    dropout_p = 0.1  # only affects training mode; identity here (eval)

    ks = jax.random.split(key, 13)
    x = jax.random.normal(ks[0], (N, C_IN, H, W), jnp.float32)

    params = {
        "w1": 0.1 * jax.random.normal(ks[1], (C_OUT, C_IN, 3, 3), jnp.float32),
        "b1": 0.1 * jax.random.normal(ks[2], (C_OUT,), jnp.float32),
        "g1": 1.0 + 0.1 * jax.random.normal(ks[3], (C_OUT,), jnp.float32),
        "be1": 0.1 * jax.random.normal(ks[4], (C_OUT,), jnp.float32),
        "m1": 0.1 * jax.random.normal(ks[5], (C_OUT,), jnp.float32),
        "v1": jax.random.uniform(ks[6], (C_OUT,), jnp.float32, 0.5, 1.5),
        "w2": 0.1 * jax.random.normal(ks[7], (C_OUT, C_OUT, 3, 3), jnp.float32),
        "b2": 0.1 * jax.random.normal(ks[8], (C_OUT,), jnp.float32),
        "g2": 1.0 + 0.1 * jax.random.normal(ks[9], (C_OUT,), jnp.float32),
        "be2": 0.1 * jax.random.normal(ks[10], (C_OUT,), jnp.float32),
        "m2": 0.1 * jax.random.normal(ks[11], (C_OUT,), jnp.float32),
        "v2": jax.random.uniform(ks[12], (C_OUT,), jnp.float32, 0.5, 1.5),
    }

    out = jax.block_until_ready(down_block_forward(x, params))
    ref = jax.block_until_ready(down_block_reference(x, params))

    assert out.shape == (N, C_OUT, H // 2, W // 2), out.shape
    # Generous tolerance covers the MXU's reduced-precision path for f32 dots;
    # storage/accumulation is f32 throughout (tighter than the old bf16 version).
    err = float(jnp.max(jnp.abs(out - ref)))
    assert jnp.allclose(out, ref, atol=5e-2, rtol=5e-2), err
    print("KERNEL_OK")
</pallas_src>

<mosaic_0001>
module attributes {stable_mosaic.version = 11 : i64} {
  func.func @_down_block_kernel(%arg0: i32, %arg1: memref<4x1x8x8x4xf32, #tpu.memory_space<vmem>>, %arg2: memref<3x3x4x8xf32, #tpu.memory_space<vmem>>, %arg3: memref<1x8xf32, #tpu.memory_space<vmem>>, %arg4: memref<3x3x8x8xf32, #tpu.memory_space<vmem>>, %arg5: memref<1x8xf32, #tpu.memory_space<vmem>>, %arg6: memref<1x8x8x8xf32, #tpu.memory_space<vmem>>, %arg7: memref<1x10x16x4xf32, #tpu.memory_space<vmem>>, %arg8: memref<1x10x16x8xf32, #tpu.memory_space<vmem>>) attributes {dimension_semantics = [#tpu.dimension_semantics<parallel>], iteration_bounds = array<i64: 2>, scalar_prefetch = 0 : i64, scratch_operands = 2 : i64, tpu.core_type = #tpu.core_type<tc>, window_params = [{transform_indices = @transform_0, window_bounds = array<i64: 4, 1, 8, 8, 4>}, {pipeline_mode = #tpu.pipeline_mode<synchronous>, transform_indices = @transform_1, window_bounds = array<i64: 3, 3, 4, 8>}, {pipeline_mode = #tpu.pipeline_mode<synchronous>, transform_indices = @transform_2, window_bounds = array<i64: 1, 8>}, {pipeline_mode = #tpu.pipeline_mode<synchronous>, transform_indices = @transform_3, window_bounds = array<i64: 3, 3, 8, 8>}, {pipeline_mode = #tpu.pipeline_mode<synchronous>, transform_indices = @transform_4, window_bounds = array<i64: 1, 8>}, {transform_indices = @transform_5, window_bounds = array<i64: 1, 8, 8, 8>}]} {
    %c0 = arith.constant 0 : index
    %c0_0 = arith.constant 0 : index
    %c0_1 = arith.constant 0 : index
    %c0_2 = arith.constant 0 : index
    %c0_3 = arith.constant 0 : index
    %0 = vector.load %arg1[%c0, %c0_0, %c0_1, %c0_2, %c0_3] : memref<4x1x8x8x4xf32, #tpu.memory_space<vmem>>, vector<1x1x8x8x4xf32>
    %1 = vector.shape_cast %0 : vector<1x1x8x8x4xf32> to vector<1x8x8x4xf32>
    %c1 = arith.constant 1 : index
    %c0_4 = arith.constant 0 : index
    %c0_5 = arith.constant 0 : index
    %c0_6 = arith.constant 0 : index
    %c0_7 = arith.constant 0 : index
    %2 = vector.load %arg1[%c1, %c0_4, %c0_5, %c0_6, %c0_7] : memref<4x1x8x8x4xf32, #tpu.memory_space<vmem>>, vector<1x1x8x8x4xf32>
    %3 = vector.shape_cast %2 : vector<1x1x8x8x4xf32> to vector<1x8x8x4xf32>
    %4 = arith.maximumf %1, %3 : vector<1x8x8x4xf32>
    %c2 = arith.constant 2 : index
    %c0_8 = arith.constant 0 : index
    %c0_9 = arith.constant 0 : index
    %c0_10 = arith.constant 0 : index
    %c0_11 = arith.constant 0 : index
    %5 = vector.load %arg1[%c2, %c0_8, %c0_9, %c0_10, %c0_11] : memref<4x1x8x8x4xf32, #tpu.memory_space<vmem>>, vector<1x1x8x8x4xf32>
    %6 = vector.shape_cast %5 : vector<1x1x8x8x4xf32> to vector<1x8x8x4xf32>
    %c3 = arith.constant 3 : index
    %c0_12 = arith.constant 0 : index
    %c0_13 = arith.constant 0 : index
    %c0_14 = arith.constant 0 : index
    %c0_15 = arith.constant 0 : index
    %7 = vector.load %arg1[%c3, %c0_12, %c0_13, %c0_14, %c0_15] : memref<4x1x8x8x4xf32, #tpu.memory_space<vmem>>, vector<1x1x8x8x4xf32>
    %8 = vector.shape_cast %7 : vector<1x1x8x8x4xf32> to vector<1x8x8x4xf32>
    %9 = arith.maximumf %6, %8 : vector<1x8x8x4xf32>
    %10 = arith.maximumf %4, %9 : vector<1x8x8x4xf32>
    %cst = arith.constant 0.000000e+00 : f32
    %11 = vector.broadcast %cst : f32 to vector<1x1x16x4xf32>
    %c0_16 = arith.constant 0 : index
    %c0_17 = arith.constant 0 : index
    %c0_18 = arith.constant 0 : index
    %c0_19 = arith.constant 0 : index
    %12 = vector.load %arg7[%c0_16, %c0_17, %c0_18, %c0_19] : memref<1x10x16x4xf32, #tpu.memory_space<vmem>>, vector<1x1x16x4xf32>
    tpu.vector_store %arg7[%c0_16, %c0_17, %c0_18, %c0_19], %11 {strides = array<i32>} : memref<1x10x16x4xf32, #tpu.memory_space<vmem>>, vector<1x1x16x4xf32>,
    %c0_20 = arith.constant 0 : index
    %c9 = arith.constant 9 : index
    %c0_21 = arith.constant 0 : index
    %c0_22 = arith.constant 0 : index
    %13 = vector.load %arg7[%c0_20, %c9, %c0_21, %c0_22] : memref<1x10x16x4xf32, #tpu.memory_space<vmem>>, vector<1x1x16x4xf32>
    tpu.vector_store %arg7[%c0_20, %c9, %c0_21, %c0_22], %11 {strides = array<i32>} : memref<1x10x16x4xf32, #tpu.memory_space<vmem>>, vector<1x1x16x4xf32>,
    %cst_23 = arith.constant 0.000000e+00 : f32
    %14 = vector.broadcast %cst_23 : f32 to vector<1x10x1x4xf32>
    %c0_24 = arith.constant 0 : index
    %c0_25 = arith.constant 0 : index
    %c0_26 = arith.constant 0 : index
    %c0_27 = arith.constant 0 : index
    %15 = vector.load %arg7[%c0_24, %c0_25, %c0_26, %c0_27] : memref<1x10x16x4xf32, #tpu.memory_space<vmem>>, vector<1x10x1x4xf32>
    tpu.vector_store %arg7[%c0_24, %c0_25, %c0_26, %c0_27], %14 {strides = array<i32>} : memref<1x10x16x4xf32, #tpu.memory_space<vmem>>, vector<1x10x1x4xf32>,
    %c0_28 = arith.constant 0 : index
    %c0_29 = arith.constant 0 : index
    %c9_30 = arith.constant 9 : index
    %c0_31 = arith.constant 0 : index
    %16 = vector.load %arg7[%c0_28, %c0_29, %c9_30, %c0_31] : memref<1x10x16x4xf32, #tpu.memory_space<vmem>>, vector<1x10x1x4xf32>
    tpu.vector_store %arg7[%c0_28, %c0_29, %c9_30, %c0_31], %14 {strides = array<i32>} : memref<1x10x16x4xf32, #tpu.memory_space<vmem>>, vector<1x10x1x4xf32>,
    %c0_32 = arith.constant 0 : index
    %c1_33 = arith.constant 1 : index
    %c1_34 = arith.constant 1 : index
    %c0_35 = arith.constant 0 : index
    %17 = vector.load %arg7[%c0_32, %c1_33, %c1_34, %c0_35] : memref<1x10x16x4xf32, #tpu.memory_space<vmem>>, vector<1x8x8x4xf32>
    tpu.vector_store %arg7[%c0_32, %c1_33, %c1_34, %c0_35], %10 {strides = array<i32>} : memref<1x10x16x4xf32, #tpu.memory_space<vmem>>, vector<1x8x8x4xf32>,
    %c0_36 = arith.constant 0 : index
    %c0_37 = arith.constant 0 : index
    %c0_38 = arith.constant 0 : index
    %c0_39 = arith.constant 0 : index
    %18 = vector.load %arg7[%c0_36, %c0_37, %c0_38, %c0_39] : memref<1x10x16x4xf32, #tpu.memory_space<vmem>>, vector<1x8x8x4xf32>
    %19 = vector.shape_cast %18 : vector<1x8x8x4xf32> to vector<64x4xf32>
    %c0_40 = arith.constant 0 : index
    %c0_41 = arith.constant 0 : index
    %c0_42 = arith.constant 0 : index
    %c0_43 = arith.constant 0 : index
    %20 = vector.load %arg2[%c0_40, %c0_41, %c0_42, %c0_43] : memref<3x3x4x8xf32, #tpu.memory_space<vmem>>, vector<1x1x4x8xf32>
    %21 = vector.shape_cast %20 : vector<1x1x4x8xf32> to vector<4x8xf32>
    %cst_44 = arith.constant dense<0.000000e+00> : vector<64x8xf32>
    %22 = tpu.matmul %19, %21, %cst_44 {dimension_numbers = #tpu.dot_dimension_numbers<[1], [0], [0], [1], [0, 0, 1, 1], [], []>} : vector<64x4xf32>, vector<4x8xf32>, vector<64x8xf32> -> vector<64x8xf32>
    %c0_45 = arith.constant 0 : index
    %c0_46 = arith.constant 0 : index
    %c1_47 = arith.constant 1 : index
    %c0_48 = arith.constant 0 : index
    %23 = vector.load %arg7[%c0_45, %c0_46, %c1_47, %c0_48] : memref<1x10x16x4xf32, #tpu.memory_space<vmem>>, vector<1x8x8x4xf32>
    %24 = vector.shape_cast %23 : vector<1x8x8x4xf32> to vector<64x4xf32>
    %c0_49 = arith.constant 0 : index
    %c1_50 = arith.constant 1 : index
    %c0_51 = arith.constant 0 : index
    %c0_52 = arith.constant 0 : index
    %25 = vector.load %arg2[%c0_49, %c1_50, %c0_51, %c0_52] : memref<3x3x4x8xf32, #tpu.memory_space<vmem>>, vector<1x1x4x8xf32>
    %26 = vector.shape_cast %25 : vector<1x1x4x8xf32> to vector<4x8xf32>
    %cst_53 = arith.constant dense<0.000000e+00> : vector<64x8xf32>
    %27 = tpu.matmul %24, %26, %cst_53 {dimension_numbers = #tpu.dot_dimension_numbers<[1], [0], [0], [1], [0, 0, 1, 1], [], []>} : vector<64x4xf32>, vector<4x8xf32>, vector<64x8xf32> -> vector<64x8xf32>
    %28 = arith.addf %22, %27 : vector<64x8xf32>
    %c0_54 = arith.constant 0 : index
    %c0_55 = arith.constant 0 : index
    %c2_56 = arith.constant 2 : index
    %c0_57 = arith.constant 0 : index
    %29 = vector.load %arg7[%c0_54, %c0_55, %c2_56, %c0_57] : memref<1x10x16x4xf32, #tpu.memory_space<vmem>>, vector<1x8x8x4xf32>
    %30 = vector.shape_cast %29 : vector<1x8x8x4xf32> to vector<64x4xf32>
    %c0_58 = arith.constant 0 : index
    %c2_59 = arith.constant 2 : index
    %c0_60 = arith.constant 0 : index
    %c0_61 = arith.constant 0 : index
    %31 = vector.load %arg2[%c0_58, %c2_59, %c0_60, %c0_61] : memref<3x3x4x8xf32, #tpu.memory_space<vmem>>, vector<1x1x4x8xf32>
    %32 = vector.shape_cast %31 : vector<1x1x4x8xf32> to vector<4x8xf32>
    %cst_62 = arith.constant dense<0.000000e+00> : vector<64x8xf32>
    %33 = tpu.matmul %30, %32, %cst_62 {dimension_numbers = #tpu.dot_dimension_numbers<[1], [0], [0], [1], [0, 0, 1, 1], [], []>} : vector<64x4xf32>, vector<4x8xf32>, vector<64x8xf32> -> vector<64x8xf32>
    %34 = arith.addf %28, %33 : vector<64x8xf32>
    %c0_63 = arith.constant 0 : index
    %c1_64 = arith.constant 1 : index
    %c0_65 = arith.constant 0 : index
    %c0_66 = arith.constant 0 : index
    %35 = vector.load %arg7[%c0_63, %c1_64, %c0_65, %c0_66] : memref<1x10x16x4xf32, #tpu.memory_space<vmem>>, vector<1x8x8x4xf32>
    %36 = vector.shape_cast %35 : vector<1x8x8x4xf32> to vector<64x4xf32>
    %c1_67 = arith.constant 1 : index
    %c0_68 = arith.constant 0 : index
    %c0_69 = arith.constant 0 : index
    %c0_70 = arith.constant 0 : index
    %37 = vector.load %arg2[%c1_67, %c0_68, %c0_69, %c0_70] : memref<3x3x4x8xf32, #tpu.memory_space<vmem>>, vector<1x1x4x8xf32>
    %38 = vector.shape_cast %37 : vector<1x1x4x8xf32> to vector<4x8xf32>
    %cst_71 = arith.constant dense<0.000000e+00> : vector<64x8xf32>
    %39 = tpu.matmul %36, %38, %cst_71 {dimension_numbers = #tpu.dot_dimension_numbers<[1], [0], [0], [1], [0, 0, 1, 1], [], []>} : vector<64x4xf32>, vector<4x8xf32>, vector<64x8xf32> -> vector<64x8xf32>
    %40 = arith.addf %34, %39 : vector<64x8xf32>
    %c0_72 = arith.constant 0 : index
    %c1_73 = arith.constant 1 : index
    %c1_74 = arith.constant 1 : index
    %c0_75 = arith.constant 0 : index
    %41 = vector.load %arg7[%c0_72, %c1_73, %c1_74, %c0_75] : memref<1x10x16x4xf32, #tpu.memory_space<vmem>>, vector<1x8x8x4xf32>
    %42 = vector.shape_cast %41 : vector<1x8x8x4xf32> to vector<64x4xf32>
    %c1_76 = arith.constant 1 : index
    %c1_77 = arith.constant 1 : index
    %c0_78 = arith.constant 0 : index
    %c0_79 = arith.constant 0 : index
    %43 = vector.load %arg2[%c1_76, %c1_77, %c0_78, %c0_79] : memref<3x3x4x8xf32, #tpu.memory_space<vmem>>, vector<1x1x4x8xf32>
    %44 = vector.shape_cast %43 : vector<1x1x4x8xf32> to vector<4x8xf32>
    %cst_80 = arith.constant dense<0.000000e+00> : vector<64x8xf32>
    %45 = tpu.matmul %42, %44, %cst_80 {dimension_numbers = #tpu.dot_dimension_numbers<[1], [0], [0], [1], [0, 0, 1, 1], [], []>} : vector<64x4xf32>, vector<4x8xf32>, vector<64x8xf32> -> vector<64x8xf32>
    %46 = arith.addf %40, %45 : vector<64x8xf32>
    %c0_81 = arith.constant 0 : index
    %c1_82 = arith.constant 1 : index
    %c2_83 = arith.constant 2 : index
    %c0_84 = arith.constant 0 : index
    %47 = vector.load %arg7[%c0_81, %c1_82, %c2_83, %c0_84] : memref<1x10x16x4xf32, #tpu.memory_space<vmem>>, vector<1x8x8x4xf32>
    %48 = vector.shape_cast %47 : vector<1x8x8x4xf32> to vector<64x4xf32>
    %c1_85 = arith.constant 1 : index
    %c2_86 = arith.constant 2 : index
    %c0_87 = arith.constant 0 : index
    %c0_88 = arith.constant 0 : index
    %49 = vector.load %arg2[%c1_85, %c2_86, %c0_87, %c0_88] : memref<3x3x4x8xf32, #tpu.memory_space<vmem>>, vector<1x1x4x8xf32>
    %50 = vector.shape_cast %49 : vector<1x1x4x8xf32> to vector<4x8xf32>
    %cst_89 = arith.constant dense<0.000000e+00> : vector<64x8xf32>
    %51 = tpu.matmul %48, %50, %cst_89 {dimension_numbers = #tpu.dot_dimension_numbers<[1], [0], [0], [1], [0, 0, 1, 1], [], []>} : vector<64x4xf32>, vector<4x8xf32>, vector<64x8xf32> -> vector<64x8xf32>
    %52 = arith.addf %46, %51 : vector<64x8xf32>
    %c0_90 = arith.constant 0 : index
    %c2_91 = arith.constant 2 : index
    %c0_92 = arith.constant 0 : index
    %c0_93 = arith.constant 0 : index
    %53 = vector.load %arg7[%c0_90, %c2_91, %c0_92, %c0_93] : memref<1x10x16x4xf32, #tpu.memory_space<vmem>>, vector<1x8x8x4xf32>
    %54 = vector.shape_cast %53 : vector<1x8x8x4xf32> to vector<64x4xf32>
    %c2_94 = arith.constant 2 : index
    %c0_95 = arith.constant 0 : index
    %c0_96 = arith.constant 0 : index
    %c0_97 = arith.constant 0 : index
    %55 = vector.load %arg2[%c2_94, %c0_95, %c0_96, %c0_97] : memref<3x3x4x8xf32, #tpu.memory_space<vmem>>, vector<1x1x4x8xf32>
    %56 = vector.shape_cast %55 : vector<1x1x4x8xf32> to vector<4x8xf32>
    %cst_98 = arith.constant dense<0.000000e+00> : vector<64x8xf32>
    %57 = tpu.matmul %54, %56, %cst_98 {dimension_numbers = #tpu.dot_dimension_numbers<[1], [0], [0], [1], [0, 0, 1, 1], [], []>} : vector<64x4xf32>, vector<4x8xf32>, vector<64x8xf32> -> vector<64x8xf32>
    %58 = arith.addf %52, %57 : vector<64x8xf32>
    %c0_99 = arith.constant 0 : index
    %c2_100 = arith.constant 2 : index
    %c1_101 = arith.constant 1 : index
    %c0_102 = arith.constant 0 : index
    %59 = vector.load %arg7[%c0_99, %c2_100, %c1_101, %c0_102] : memref<1x10x16x4xf32, #tpu.memory_space<vmem>>, vector<1x8x8x4xf32>
    %60 = vector.shape_cast %59 : vector<1x8x8x4xf32> to vector<64x4xf32>
    %c2_103 = arith.constant 2 : index
    %c1_104 = arith.constant 1 : index
    %c0_105 = arith.constant 0 : index
    %c0_106 = arith.constant 0 : index
    %61 = vector.load %arg2[%c2_103, %c1_104, %c0_105, %c0_106] : memref<3x3x4x8xf32, #tpu.memory_space<vmem>>, vector<1x1x4x8xf32>
    %62 = vector.shape_cast %61 : vector<1x1x4x8xf32> to vector<4x8xf32>
    %cst_107 = arith.constant dense<0.000000e+00> : vector<64x8xf32>
    %63 = tpu.matmul %60, %62, %cst_107 {dimension_numbers = #tpu.dot_dimension_numbers<[1], [0], [0], [1], [0, 0, 1, 1], [], []>} : vector<64x4xf32>, vector<4x8xf32>, vector<64x8xf32> -> vector<64x8xf32>
    %64 = arith.addf %58, %63 : vector<64x8xf32>
    %c0_108 = arith.constant 0 : index
    %c2_109 = arith.constant 2 : index
    %c2_110 = arith.constant 2 : index
    %c0_111 = arith.constant 0 : index
    %65 = vector.load %arg7[%c0_108, %c2_109, %c2_110, %c0_111] : memref<1x10x16x4xf32, #tpu.memory_space<vmem>>, vector<1x8x8x4xf32>
    %66 = vector.shape_cast %65 : vector<1x8x8x4xf32> to vector<64x4xf32>
    %c2_112 = arith.constant 2 : index
    %c2_113 = arith.constant 2 : index
    %c0_114 = arith.constant 0 : index
    %c0_115 = arith.constant 0 : index
    %67 = vector.load %arg2[%c2_112, %c2_113, %c0_114, %c0_115] : memref<3x3x4x8xf32, #tpu.memory_space<vmem>>, vector<1x1x4x8xf32>
    %68 = vector.shape_cast %67 : vector<1x1x4x8xf32> to vector<4x8xf32>
    %cst_116 = arith.constant dense<0.000000e+00> : vector<64x8xf32>
    %69 = tpu.matmul %66, %68, %cst_116 {dimension_numbers = #tpu.dot_dimension_numbers<[1], [0], [0], [1], [0, 0, 1, 1], [], []>} : vector<64x4xf32>, vector<4x8xf32>, vector<64x8xf32> -> vector<64x8xf32>
    %70 = arith.addf %64, %69 : vector<64x8xf32>
    %c0_117 = arith.constant 0 : index
    %c0_118 = arith.constant 0 : index
    %71 = vector.load %arg3[%c0_117, %c0_118] : memref<1x8xf32, #tpu.memory_space<vmem>>, vector<1x8xf32>
    %72 = vector.broadcast %71 : vector<1x8xf32> to vector<64x8xf32>
    %73 = arith.addf %70, %72 : vector<64x8xf32>
    %cst_119 = arith.constant 0.000000e+00 : f32
    %74 = vector.broadcast %cst_119 : f32 to vector<64x8xf32>
    %75 = arith.cmpf ogt, %73, %74 : vector<64x8xf32>
    %cst_120 = arith.constant 0.00999999977 : f32
    %76 = vector.broadcast %cst_120 : f32 to vector<64x8xf32>
    %77 = arith.mulf %76, %73 : vector<64x8xf32>
    %78 = arith.select %75, %73, %77 : vector<64x8xi1>, vector<64x8xf32>
    %79 = vector.shape_cast %78 : vector<64x8xf32> to vector<1x8x8x8xf32>
    %cst_121 = arith.constant 0.000000e+00 : f32
    %80 = vector.broadcast %cst_121 : f32 to vector<1x1x16x8xf32>
    %c0_122 = arith.constant 0 : index
    %c0_123 = arith.constant 0 : index
    %c0_124 = arith.constant 0 : index
    %c0_125 = arith.constant 0 : index
    %81 = vector.load %arg8[%c0_122, %c0_123, %c0_124, %c0_125] : memref<1x10x16x8xf32, #tpu.memory_space<vmem>>, vector<1x1x16x8xf32>
    tpu.vector_store %arg8[%c0_122, %c0_123, %c0_124, %c0_125], %80 {strides = array<i32>} : memref<1x10x16x8xf32, #tpu.memory_space<vmem>>, vector<1x1x16x8xf32>,
    %c0_126 = arith.constant 0 : index
    %c9_127 = arith.constant 9 : index
    %c0_128 = arith.constant 0 : index
    %c0_129 = arith.constant 0 : index
    %82 = vector.load %arg8[%c0_126, %c9_127, %c0_128, %c0_129] : memref<1x10x16x8xf32, #tpu.memory_space<vmem>>, vector<1x1x16x8xf32>
    tpu.vector_store %arg8[%c0_126, %c9_127, %c0_128, %c0_129], %80 {strides = array<i32>} : memref<1x10x16x8xf32, #tpu.memory_space<vmem>>, vector<1x1x16x8xf32>,
    %cst_130 = arith.constant 0.000000e+00 : f32
    %83 = vector.broadcast %cst_130 : f32 to vector<1x10x1x8xf32>
    %c0_131 = arith.constant 0 : index
    %c0_132 = arith.constant 0 : index
    %c0_133 = arith.constant 0 : index
    %c0_134 = arith.constant 0 : index
    %84 = vector.load %arg8[%c0_131, %c0_132, %c0_133, %c0_134] : memref<1x10x16x8xf32, #tpu.memory_space<vmem>>, vector<1x10x1x8xf32>
    tpu.vector_store %arg8[%c0_131, %c0_132, %c0_133, %c0_134], %83 {strides = array<i32>} : memref<1x10x16x8xf32, #tpu.memory_space<vmem>>, vector<1x10x1x8xf32>,
    %c0_135 = arith.constant 0 : index
    %c0_136 = arith.constant 0 : index
    %c9_137 = arith.constant 9 : index
    %c0_138 = arith.constant 0 : index
    %85 = vector.load %arg8[%c0_135, %c0_136, %c9_137, %c0_138] : memref<1x10x16x8xf32, #tpu.memory_space<vmem>>, vector<1x10x1x8xf32>
    tpu.vector_store %arg8[%c0_135, %c0_136, %c9_137, %c0_138], %83 {strides = array<i32>} : memref<1x10x16x8xf32, #tpu.memory_space<vmem>>, vector<1x10x1x8xf32>,
    %c0_139 = arith.constant 0 : index
    %c1_140 = arith.constant 1 : index
    %c1_141 = arith.constant 1 : index
    %c0_142 = arith.constant 0 : index
    %86 = vector.load %arg8[%c0_139, %c1_140, %c1_141, %c0_142] : memref<1x10x16x8xf32, #tpu.memory_space<vmem>>, vector<1x8x8x8xf32>
    tpu.vector_store %arg8[%c0_139, %c1_140, %c1_141, %c0_142], %79 {strides = array<i32>} : memref<1x10x16x8xf32, #tpu.memory_space<vmem>>, vector<1x8x8x8xf32>,
    %c0_143 = arith.constant 0 : index
    %c0_144 = arith.constant 0 : index
    %c0_145 = arith.constant 0 : index
    %c0_146 = arith.constant 0 : index
    %87 = vector.load %arg8[%c0_143, %c0_144, %c0_145, %c0_146] : memref<1x10x16x8xf32, #tpu.memory_space<vmem>>, vector<1x8x8x8xf32>
    %88 = vector.shape_cast %87 : vector<1x8x8x8xf32> to vector<64x8xf32>
    %c0_147 = arith.constant 0 : index
    %c0_148 = arith.constant 0 : index
    %c0_149 = arith.constant 0 : index
    %c0_150 = arith.constant 0 : index
    %89 = vector.load %arg4[%c0_147, %c0_148, %c0_149, %c0_150] : memref<3x3x8x8xf32, #tpu.memory_space<vmem>>, vector<1x1x8x8xf32>
    %90 = vector.shape_cast %89 : vector<1x1x8x8xf32> to vector<8x8xf32>
    %cst_151 = arith.constant dense<0.000000e+00> : vector<64x8xf32>
    %91 = tpu.matmul %88, %90, %cst_151 {dimension_numbers = #tpu.dot_dimension_numbers<[1], [0], [0], [1], [0, 0, 1, 1], [], []>} : vector<64x8xf32>, vector<8x8xf32>, vector<64x8xf32> -> vector<64x8xf32>
    %c0_152 = arith.constant 0 : index
    %c0_153 = arith.constant 0 : index
    %c1_154 = arith.constant 1 : index
    %c0_155 = arith.constant 0 : index
    %92 = vector.load %arg8[%c0_152, %c0_153, %c1_154, %c0_155] : memref<1x10x16x8xf32, #tpu.memory_space<vmem>>, vector<1x8x8x8xf32>
    %93 = vector.shape_cast %92 : vector<1x8x8x8xf32> to vector<64x8xf32>
    %c0_156 = arith.constant 0 : index
    %c1_157 = arith.constant 1 : index
    %c0_158 = arith.constant 0 : index
    %c0_159 = arith.constant 0 : index
    %94 = vector.load %arg4[%c0_156, %c1_157, %c0_158, %c0_159] : memref<3x3x8x8xf32, #tpu.memory_space<vmem>>, vector<1x1x8x8xf32>
    %95 = vector.shape_cast %94 : vector<1x1x8x8xf32> to vector<8x8xf32>
    %cst_160 = arith.constant dense<0.000000e+00> : vector<64x8xf32>
    %96 = tpu.matmul %93, %95, %cst_160 {dimension_numbers = #tpu.dot_dimension_numbers<[1], [0], [0], [1], [0, 0, 1, 1], [], []>} : vector<64x8xf32>, vector<8x8xf32>, vector<64x8xf32> -> vector<64x8xf32>
    %97 = arith.addf %91, %96 : vector<64x8xf32>
    %c0_161 = arith.constant 0 : index
    %c0_162 = arith.constant 0 : index
    %c2_163 = arith.constant 2 : index
    %c0_164 = arith.constant 0 : index
    %98 = vector.load %arg8[%c0_161, %c0_162, %c2_163, %c0_164] : memref<1x10x16x8xf32, #tpu.memory_space<vmem>>, vector<1x8x8x8xf32>
    %99 = vector.shape_cast %98 : vector<1x8x8x8xf32> to vector<64x8xf32>
    %c0_165 = arith.constant 0 : index
    %c2_166 = arith.constant 2 : index
    %c0_167 = arith.constant 0 : index
    %c0_168 = arith.constant 0 : index
    %100 = vector.load %arg4[%c0_165, %c2_166, %c0_167, %c0_168] : memref<3x3x8x8xf32, #tpu.memory_space<vmem>>, vector<1x1x8x8xf32>
    %101 = vector.shape_cast %100 : vector<1x1x8x8xf32> to vector<8x8xf32>
    %cst_169 = arith.constant dense<0.000000e+00> : vector<64x8xf32>
    %102 = tpu.matmul %99, %101, %cst_169 {dimension_numbers = #tpu.dot_dimension_numbers<[1], [0], [0], [1], [0, 0, 1, 1], [], []>} : vector<64x8xf32>, vector<8x8xf32>, vector<64x8xf32> -> vector<64x8xf32>
    %103 = arith.addf %97, %102 : vector<64x8xf32>
    %c0_170 = arith.constant 0 : index
    %c1_171 = arith.constant 1 : index
    %c0_172 = arith.constant 0 : index
    %c0_173 = arith.constant 0 : index
    %104 = vector.load %arg8[%c0_170, %c1_171, %c0_172, %c0_173] : memref<1x10x16x8xf32, #tpu.memory_space<vmem>>, vector<1x8x8x8xf32>
    %105 = vector.shape_cast %104 : vector<1x8x8x8xf32> to vector<64x8xf32>
    %c1_174 = arith.constant 1 : index
    %c0_175 = arith.constant 0 : index
    %c0_176 = arith.constant 0 : index
    %c0_177 = arith.constant 0 : index
    %106 = vector.load %arg4[%c1_174, %c0_175, %c0_176, %c0_177] : memref<3x3x8x8xf32, #tpu.memory_space<vmem>>, vector<1x1x8x8xf32>
    %107 = vector.shape_cast %106 : vector<1x1x8x8xf32> to vector<8x8xf32>
    %cst_178 = arith.constant dense<0.000000e+00> : vector<64x8xf32>
    %108 = tpu.matmul %105, %107, %cst_178 {dimension_numbers = #tpu.dot_dimension_numbers<[1], [0], [0], [1], [0, 0, 1, 1], [], []>} : vector<64x8xf32>, vector<8x8xf32>, vector<64x8xf32> -> vector<64x8xf32>
    %109 = arith.addf %103, %108 : vector<64x8xf32>
    %c0_179 = arith.constant 0 : index
    %c1_180 = arith.constant 1 : index
    %c1_181 = arith.constant 1 : index
    %c0_182 = arith.constant 0 : index
    %110 = vector.load %arg8[%c0_179, %c1_180, %c1_181, %c0_182] : memref<1x10x16x8xf32, #tpu.memory_space<vmem>>, vector<1x8x8x8xf32>
    %111 = vector.shape_cast %110 : vector<1x8x8x8xf32> to vector<64x8xf32>
    %c1_183 = arith.constant 1 : index
    %c1_184 = arith.constant 1 : index
    %c0_185 = arith.constant 0 : index
    %c0_186 = arith.constant 0 : index
    %112 = vector.load %arg4[%c1_183, %c1_184, %c0_185, %c0_186] : memref<3x3x8x8xf32, #tpu.memory_space<vmem>>, vector<1x1x8x8xf32>
    %113 = vector.shape_cast %112 : vector<1x1x8x8xf32> to vector<8x8xf32>
    %cst_187 = arith.constant dense<0.000000e+00> : vector<64x8xf32>
    %114 = tpu.matmul %111, %113, %cst_187 {dimension_numbers = #tpu.dot_dimension_numbers<[1], [0], [0], [1], [0, 0, 1, 1], [], []>} : vector<64x8xf32>, vector<8x8xf32>, vector<64x8xf32> -> vector<64x8xf32>
    %115 = arith.addf %109, %114 : vector<64x8xf32>
    %c0_188 = arith.constant 0 : index
    %c1_189 = arith.constant 1 : index
    %c2_190 = arith.constant 2 : index
    %c0_191 = arith.constant 0 : index
    %116 = vector.load %arg8[%c0_188, %c1_189, %c2_190, %c0_191] : memref<1x10x16x8xf32, #tpu.memory_space<vmem>>, vector<1x8x8x8xf32>
    %117 = vector.shape_cast %116 : vector<1x8x8x8xf32> to vector<64x8xf32>
    %c1_192 = arith.constant 1 : index
    %c2_193 = arith.constant 2 : index
    %c0_194 = arith.constant 0 : index
    %c0_195 = arith.constant 0 : index
    %118 = vector.load %arg4[%c1_192, %c2_193, %c0_194, %c0_195] : memref<3x3x8x8xf32, #tpu.memory_space<vmem>>, vector<1x1x8x8xf32>
    %119 = vector.shape_cast %118 : vector<1x1x8x8xf32> to vector<8x8xf32>
    %cst_196 = arith.constant dense<0.000000e+00> : vector<64x8xf32>
    %120 = tpu.matmul %117, %119, %cst_196 {dimension_numbers = #tpu.dot_dimension_numbers<[1], [0], [0], [1], [0, 0, 1, 1], [], []>} : vector<64x8xf32>, vector<8x8xf32>, vector<64x8xf32> -> vector<64x8xf32>
    %121 = arith.addf %115, %120 : vector<64x8xf32>
    %c0_197 = arith.constant 0 : index
    %c2_198 = arith.constant 2 : index
    %c0_199 = arith.constant 0 : index
    %c0_200 = arith.constant 0 : index
    %122 = vector.load %arg8[%c0_197, %c2_198, %c0_199, %c0_200] : memref<1x10x16x8xf32, #tpu.memory_space<vmem>>, vector<1x8x8x8xf32>
    %123 = vector.shape_cast %122 : vector<1x8x8x8xf32> to vector<64x8xf32>
    %c2_201 = arith.constant 2 : index
    %c0_202 = arith.constant 0 : index
    %c0_203 = arith.constant 0 : index
    %c0_204 = arith.constant 0 : index
    %124 = vector.load %arg4[%c2_201, %c0_202, %c0_203, %c0_204] : memref<3x3x8x8xf32, #tpu.memory_space<vmem>>, vector<1x1x8x8xf32>
    %125 = vector.shape_cast %124 : vector<1x1x8x8xf32> to vector<8x8xf32>
    %cst_205 = arith.constant dense<0.000000e+00> : vector<64x8xf32>
    %126 = tpu.matmul %123, %125, %cst_205 {dimension_numbers = #tpu.dot_dimension_numbers<[1], [0], [0], [1], [0, 0, 1, 1], [], []>} : vector<64x8xf32>, vector<8x8xf32>, vector<64x8xf32> -> vector<64x8xf32>
    %127 = arith.addf %121, %126 : vector<64x8xf32>
    %c0_206 = arith.constant 0 : index
    %c2_207 = arith.constant 2 : index
    %c1_208 = arith.constant 1 : index
    %c0_209 = arith.constant 0 : index
    %128 = vector.load %arg8[%c0_206, %c2_207, %c1_208, %c0_209] : memref<1x10x16x8xf32, #tpu.memory_space<vmem>>, vector<1x8x8x8xf32>
    %129 = vector.shape_cast %128 : vector<1x8x8x8xf32> to vector<64x8xf32>
    %c2_210 = arith.constant 2 : index
    %c1_211 = arith.constant 1 : index
    %c0_212 = arith.constant 0 : index
    %c0_213 = arith.constant 0 : index
    %130 = vector.load %arg4[%c2_210, %c1_211, %c0_212, %c0_213] : memref<3x3x8x8xf32, #tpu.memory_space<vmem>>, vector<1x1x8x8xf32>
    %131 = vector.shape_cast %130 : vector<1x1x8x8xf32> to vector<8x8xf32>
    %cst_214 = arith.constant dense<0.000000e+00> : vector<64x8xf32>
    %132 = tpu.matmul %129, %131, %cst_214 {dimension_numbers = #tpu.dot_dimension_numbers<[1], [0], [0], [1], [0, 0, 1, 1], [], []>} : vector<64x8xf32>, vector<8x8xf32>, vector<64x8xf32> -> vector<64x8xf32>
    %133 = arith.addf %127, %132 : vector<64x8xf32>
    %c0_215 = arith.constant 0 : index
    %c2_216 = arith.constant 2 : index
    %c2_217 = arith.constant 2 : index
    %c0_218 = arith.constant 0 : index
    %134 = vector.load %arg8[%c0_215, %c2_216, %c2_217, %c0_218] : memref<1x10x16x8xf32, #tpu.memory_space<vmem>>, vector<1x8x8x8xf32>
    %135 = vector.shape_cast %134 : vector<1x8x8x8xf32> to vector<64x8xf32>
    %c2_219 = arith.constant 2 : index
    %c2_220 = arith.constant 2 : index
    %c0_221 = arith.constant 0 : index
    %c0_222 = arith.constant 0 : index
    %136 = vector.load %arg4[%c2_219, %c2_220, %c0_221, %c0_222] : memref<3x3x8x8xf32, #tpu.memory_space<vmem>>, vector<1x1x8x8xf32>
    %137 = vector.shape_cast %136 : vector<1x1x8x8xf32> to vector<8x8xf32>
    %cst_223 = arith.constant dense<0.000000e+00> : vector<64x8xf32>
    %138 = tpu.matmul %135, %137, %cst_223 {dimension_numbers = #tpu.dot_dimension_numbers<[1], [0], [0], [1], [0, 0, 1, 1], [], []>} : vector<64x8xf32>, vector<8x8xf32>, vector<64x8xf32> -> vector<64x8xf32>
    %139 = arith.addf %133, %138 : vector<64x8xf32>
    %c0_224 = arith.constant 0 : index
    %c0_225 = arith.constant 0 : index
    %140 = vector.load %arg5[%c0_224, %c0_225] : memref<1x8xf32, #tpu.memory_space<vmem>>, vector<1x8xf32>
    %141 = vector.broadcast %140 : vector<1x8xf32> to vector<64x8xf32>
    %142 = arith.addf %139, %141 : vector<64x8xf32>
    %cst_226 = arith.constant 0.000000e+00 : f32
    %143 = vector.broadcast %cst_226 : f32 to vector<64x8xf32>
    %144 = arith.cmpf ogt, %142, %143 : vector<64x8xf32>
    %cst_227 = arith.constant 0.00999999977 : f32
    %145 = vector.broadcast %cst_227 : f32 to vector<64x8xf32>
    %146 = arith.mulf %145, %142 : vector<64x8xf32>
    %147 = arith.select %144, %142, %146 : vector<64x8xi1>, vector<64x8xf32>
    %148 = vector.shape_cast %147 : vector<64x8xf32> to vector<1x8x8x8xf32>
    %c0_228 = arith.constant 0 : index
    %c0_229 = arith.constant 0 : index
    %c0_230 = arith.constant 0 : index
    %c0_231 = arith.constant 0 : index
    %149 = vector.load %arg6[%c0_228, %c0_229, %c0_230, %c0_231] : memref<1x8x8x8xf32, #tpu.memory_space<vmem>>, vector<1x8x8x8xf32>
    tpu.vector_store %arg6[%c0_228, %c0_229, %c0_230, %c0_231], %148 {strides = array<i32>} : memref<1x8x8x8xf32, #tpu.memory_space<vmem>>, vector<1x8x8x8xf32>,
    return
  }
  func.func @transform_0(%arg0: i32) -> (i32, i32, i32, i32, i32) {
    %c0_i32 = arith.constant 0 : i32
    %c0_i32_0 = arith.constant 0 : i32
    %c0_i32_1 = arith.constant 0 : i32
    %c0_i32_2 = arith.constant 0 : i32
    %c0_i32_3 = arith.constant 0 : i32
    return %c0_i32, %arg0, %c0_i32_0, %c0_i32_1, %c0_i32_2 : i32, i32, i32, i32, i32
  }
  func.func @transform_1(%arg0: i32) -> (i32, i32, i32, i32) {
    %c0_i32 = arith.constant 0 : i32
    %c0_i32_0 = arith.constant 0 : i32
    %c0_i32_1 = arith.constant 0 : i32
    %c0_i32_2 = arith.constant 0 : i32
    %c0_i32_3 = arith.constant 0 : i32
    return %c0_i32, %c0_i32_0, %c0_i32_1, %c0_i32_2 : i32, i32, i32, i32
  }
  func.func @transform_2(%arg0: i32) -> (i32, i32) {
    %c0_i32 = arith.constant 0 : i32
    %c0_i32_0 = arith.constant 0 : i32
    %c0_i32_1 = arith.constant 0 : i32
    return %c0_i32, %c0_i32_0 : i32, i32
  }
  func.func @transform_3(%arg0: i32) -> (i32, i32, i32, i32) {
    %c0_i32 = arith.constant 0 : i32
    %c0_i32_0 = arith.constant 0 : i32
    %c0_i32_1 = arith.constant 0 : i32
    %c0_i32_2 = arith.constant 0 : i32
    %c0_i32_3 = arith.constant 0 : i32
    return %c0_i32, %c0_i32_0, %c0_i32_1, %c0_i32_2 : i32, i32, i32, i32
  }
  func.func @transform_4(%arg0: i32) -> (i32, i32) {
    %c0_i32 = arith.constant 0 : i32
    %c0_i32_0 = arith.constant 0 : i32
    %c0_i32_1 = arith.constant 0 : i32
    return %c0_i32, %c0_i32_0 : i32, i32
  }
  func.func @transform_5(%arg0: i32) -> (i32, i32, i32, i32) {
    %c0_i32 = arith.constant 0 : i32
    %c0_i32_0 = arith.constant 0 : i32
    %c0_i32_1 = arith.constant 0 : i32
    %c0_i32_2 = arith.constant 0 : i32
    return %arg0, %c0_i32, %c0_i32_0, %c0_i32_1 : i32, i32, i32, i32
  }
}

</mosaic_0001>

<bundles_post_ra>
// kernel: tpu_custom_call.1
= control target key start
LH: loop header
LB: loop body
LE: loop exit
PB: predicated region body
PF: predicated region fallthrough
CT: control target
= control target key end

     0   :  { %10 = vsyncpa [#allocation6], 0  ;;  %s3368_s0 = inlined_call_operand.vmem [shape: f32[4,2,8,8,4], index: 0, kind: input, shape index: {}]   ;;  %s3369_s1 = inlined_call_operand.vmem [shape: f32[3,3,4,8], index: 1, kind: input, shape index: {}]   ;;  %s3370_s2 = inlined_call_operand.vmem [shape: f32[1,8], index: 2, kind: input, shape index: {}]   ;;  %s3371_s3 = inlined_call_operand.vmem [shape: f32[3,3,8,8], index: 3, kind: input, shape index: {}]   ;;  %s3372_s4 = inlined_call_operand.vmem [shape: f32[1,8], index: 4, kind: input, shape index: {}]   ;;  %s3373_s5 = inlined_call_operand.hbm [shape: f32[2,8,8,8], index: 5, kind: output, shape index: {}]  }
   0x1   :  { %12 = vsyncpa [#allocation6 + $0x1], 0  ;;  %s2520_s18 = smov 0   ;;  %s2522_s19 = smov 0  }
   0x2   :  { %s2524_s20 = smov 0   ;;  %s2526_s21 = smov 0  }
   0x3 LB: > { %s2167_s22 = sadd.s32 4294967295, %s2485_s21   ;;  %s2168_s23 = sadd.s32 4294967294, %s2485_s21   ;;  %s2485_s21 = sphi %s2526_s21, %s3379_s21   ;;  %s2481_s20 = sphi %s2524_s20, %s3378_s20   ;;  %s2477_s19 = sphi %s2522_s19, %s3377_s19   ;;  %s2473_s18 = sphi %s2520_s18, %s3376_s18  }
   0x4   : > { %s2543_s24 = sadd.s32 1, %s2485_s21   ;;  %s25_s25 = sadd.s32 1, %s2481_s20 }
   0x5   : > { %s22_s26 = ssub.s32 %s2485_s21, %s2543_s24  ;;  %p32_p0 = scmp.ne.s32.totalorder %s2481_s20, %s2477_s19 }
   0x6   : > { %p23_p1 = scmp.eq.s32.totalorder %s22_s26, 0  ;;  %p33_p2 = scmp.eq.s32.totalorder %s2485_s21, 0 }
   0x7   : > { %p146_p3 = scmp.eq.s32.totalorder %s2167_s22, 1  ;;  %p151_p4 = scmp.ne.s32.totalorder %s2477_s19, %s2473_s18 }
   0x8   : > { %s2556_s27 = scalar_select %p23_p1, %s2481_s20, %s25_s25  }
   0x9   : > { %p34_p5 = por %p33_p2, %p32_p0  ;;  %p2558_p6 = por %p146_p3, %p32_p0 }
   0xa   : > { %p152_p7 = scmp.eq.s32.totalorder %s2168_s23, 1  ;;  %p2170_p9 = scmp.ge.s32.totalorder %s2485_s21, 2 }
   0xc   : > { %p2562_p8 = por %p152_p7, %p151_p4  ;;  %180 = sbr.rel (%p2170_p9) target bundleno = 53 (0x35), region = 32 }
  0x11   : > { %183 = sbr.rel (!%p34_p5) target bundleno = 53 (0x35), region = 36  ;;  %s185_s30 = sand.u32 (%p34_p5), 1, %s2481_s20  }
  0x12   : > { %s2375_s6 = sshll.u32 (%p34_p5), %s2485_s21, 6  ;;  %s2171_s7 = sshll.u32 (%p34_p5), %s185_s30, 8 }
  0x13   : > { %s2574_s10 = scalar_lea.vmem (%p34_p5), %s3368_s0, %s2375_s6  ;;  %s2579_s11 = scalar_lea.vmem (%p34_p5), [#allocation4], %s2171_s7 }
  0x14   : > { %v281_v0 = vld [vmem:[%s2574_s10] sm:$0xff] (%p34_p5)  ;;  %v283_v1 = vld [vmem:[%s2574_s10 + $0x8] sm:$0xff] (%p34_p5)  ;;  %v285_v2 = vld [vmem:[%s2574_s10 + $0x10] sm:$0xff] (%p34_p5) }
  0x15   : > { %282 = vst [vmem:[%s2579_s11] sm:$0xff] (%p34_p5), %v281_v0  ;;  %v287_v3 = vld [vmem:[%s2574_s10 + $0x18] sm:$0xff] (%p34_p5)  ;;  %v289_v4 = vld [vmem:[%s2574_s10 + $0x20] sm:$0xff] (%p34_p5)  ;;  %v291_v5 = vld [vmem:[%s2574_s10 + $0x28] sm:$0xff] (%p34_p5) }
  0x16   : > { %284 = vst [vmem:[%s2579_s11 + $0x8] sm:$0xff] %v283_v1  ;;  %v293_v6 = vld [vmem:[%s2574_s10 + $0x30] sm:$0xff]  ;;  %v295_v7 = vld [vmem:[%s2574_s10 + $0x38] sm:$0xff]  ;;  %v297_v8 = vld [vmem:[%s2574_s10 + $0x80] sm:$0xff] }
  0x17   : > { %286 = vst [vmem:[%s2579_s11 + $0x10] sm:$0xff] %v285_v2  ;;  %v299_v9 = vld [vmem:[%s2574_s10 + $0x88] sm:$0xff]  ;;  %v301_v10 = vld [vmem:[%s2574_s10 + $0x90] sm:$0xff]  ;;  %v303_v11 = vld [vmem:[%s2574_s10 + $0x98] sm:$0xff] }
  0x18   : > { %288 = vst [vmem:[%s2579_s11 + $0x18] sm:$0xff] %v287_v3  ;;  %v305_v12 = vld [vmem:[%s2574_s10 + $0xa0] sm:$0xff]  ;;  %v307_v13 = vld [vmem:[%s2574_s10 + $0xa8] sm:$0xff]  ;;  %v309_v14 = vld [vmem:[%s2574_s10 + $0xb0] sm:$0xff] }
  0x19   : > { %290 = vst [vmem:[%s2579_s11 + $0x20] sm:$0xff] %v289_v4  ;;  %v311_v15 = vld [vmem:[%s2574_s10 + $0xb8] sm:$0xff]  ;;  %v313_v16 = vld [vmem:[%s2574_s10 + $0x100] sm:$0xff]  ;;  %v315_v17 = vld [vmem:[%s2574_s10 + $0x108] sm:$0xff] }
  0x1a   : > { %292 = vst [vmem:[%s2579_s11 + $0x28] sm:$0xff] %v291_v5  ;;  %v317_v18 = vld [vmem:[%s2574_s10 + $0x110] sm:$0xff]  ;;  %v319_v19 = vld [vmem:[%s2574_s10 + $0x118] sm:$0xff]  ;;  %v321_v20 = vld [vmem:[%s2574_s10 + $0x120] sm:$0xff] }
  0x1b   : > { %294 = vst [vmem:[%s2579_s11 + $0x30] sm:$0xff] %v293_v6  ;;  %v323_v21 = vld [vmem:[%s2574_s10 + $0x128] sm:$0xff]  ;;  %v325_v22 = vld [vmem:[%s2574_s10 + $0x130] sm:$0xff]  ;;  %v327_v23 = vld [vmem:[%s2574_s10 + $0x138] sm:$0xff] }
  0x1c   : > { %296 = vst [vmem:[%s2579_s11 + $0x38] sm:$0xff] %v295_v7  ;;  %v329_v24 = vld [vmem:[%s2574_s10 + $0x180] sm:$0xff]  ;;  %v331_v25 = vld [vmem:[%s2574_s10 + $0x188] sm:$0xff]  ;;  %v333_v26 = vld [vmem:[%s2574_s10 + $0x190] sm:$0xff] }
  0x1d   : > { %298 = vst [vmem:[%s2579_s11 + $0x40] sm:$0xff] %v297_v8  ;;  %v335_v27 = vld [vmem:[%s2574_s10 + $0x198] sm:$0xff]  ;;  %v337_v28 = vld [vmem:[%s2574_s10 + $0x1a0] sm:$0xff]  ;;  %v339_v29 = vld [vmem:[%s2574_s10 + $0x1a8] sm:$0xff] }
  0x1e   : > { %300 = vst [vmem:[%s2579_s11 + $0x48] sm:$0xff] %v299_v9  ;;  %v341_v30 = vld [vmem:[%s2574_s10 + $0x1b0] sm:$0xff]  ;;  %v343_v31 = vld [vmem:[%s2574_s10 + $0x1b8] sm:$0xff] }
  0x1f   : > { %302 = vst [vmem:[%s2579_s11 + $0x50] sm:$0xff] %v301_v10 }
  0x20   : > { %304 = vst [vmem:[%s2579_s11 + $0x58] sm:$0xff] %v303_v11 }
  0x21   : > { %306 = vst [vmem:[%s2579_s11 + $0x60] sm:$0xff] %v305_v12 }
  0x22   : > { %308 = vst [vmem:[%s2579_s11 + $0x68] sm:$0xff] %v307_v13 }
  0x23   : > { %310 = vst [vmem:[%s2579_s11 + $0x70] sm:$0xff] %v309_v14 }
  0x24   : > { %312 = vst [vmem:[%s2579_s11 + $0x78] sm:$0xff] %v311_v15 }
  0x25   : > { %314 = vst [vmem:[%s2579_s11 + $0x80] sm:$0xff] %v313_v16 }
  0x26   : > { %316 = vst [vmem:[%s2579_s11 + $0x88] sm:$0xff] %v315_v17 }
  0x27   : > { %318 = vst [vmem:[%s2579_s11 + $0x90] sm:$0xff] %v317_v18 }
  0x28   : > { %320 = vst [vmem:[%s2579_s11 + $0x98] sm:$0xff] %v319_v19 }
  0x29   : > { %322 = vst [vmem:[%s2579_s11 + $0xa0] sm:$0xff] %v321_v20 }
  0x2a   : > { %324 = vst [vmem:[%s2579_s11 + $0xa8] sm:$0xff] %v323_v21 }
  0x2b   : > { %326 = vst [vmem:[%s2579_s11 + $0xb0] sm:$0xff] %v325_v22 }
  0x2c   : > { %328 = vst [vmem:[%s2579_s11 + $0xb8] sm:$0xff] %v327_v23 }
  0x2d   : > { %330 = vst [vmem:[%s2579_s11 + $0xc0] sm:$0xff] %v329_v24 }
  0x2e   : > { %332 = vst [vmem:[%s2579_s11 + $0xc8] sm:$0xff] %v331_v25 }
  0x2f   : > { %334 = vst [vmem:[%s2579_s11 + $0xd0] sm:$0xff] %v333_v26 }
  0x30   : > { %336 = vst [vmem:[%s2579_s11 + $0xd8] sm:$0xff] %v335_v27 }
  0x31   : > { %338 = vst [vmem:[%s2579_s11 + $0xe0] sm:$0xff] %v337_v28 }
  0x32   : > { %340 = vst [vmem:[%s2579_s11 + $0xe8] sm:$0xff] %v339_v29 }
  0x33   : > { %342 = vst [vmem:[%s2579_s11 + $0xf0] sm:$0xff] %v341_v30 }
  0x34   : > { %344 = vst [vmem:[%s2579_s11 + $0xf8] sm:$0xff] %v343_v31 }
  0x35 PF: > { %p2174_p10 = scmp.ge.s32.totalorder %s2485_s21, 1  ;;  %p349_p11 = scmp.lt.s32.totalorder %s2485_s21, 3 }
  0x37   : > { %p350_p12 = pnand %p2174_p10, %p349_p11 }
  0x38   : > { %s2651_s16 = sand.u32 (!%p350_p12), 1, %s2477_s19   ;;  %s2376_s11 = sshll.u32 (!%p350_p12), %s2167_s22, 6 }
  0x39   : > { %353 = sbr.rel (%p350_p12) target bundleno = 649 (0x289), region = 74  ;;  %s2175_s17 = sshll.u32 (!%p350_p12), %s2651_s16, 8 }
  0x3a   : > { %s2666_s6 = scalar_lea.vmem (!%p350_p12), [#allocation4], %s2175_s17  ;;  %s2176_s9 = sshll.u32 (!%p350_p12), %s2651_s16, 6 }
  0x3b   : > { %s3287_s10 = scalar_lea.vmem (!%p350_p12), [#allocation5], %s2176_s9  ;;  %s2096_s14 = scalar_lea.hbm (!%p350_p12), %s3373_s5, %s2376_s11 }
  0x3c   : > { %s2097_s15 = sshll.u32 (!%p350_p12), %s3287_s10, 4  ;;  %s2099_s17 = sshll.u32 (!%p350_p12), %s2096_s14, 4  ;;  %s2098_s15 = int_to_ptr.vmem [resolvable:$true] %s2097_s15  ;;  %s2100_s17 = int_to_ptr.hbm [resolvable:$true] %s2099_s17 }
  0x3d   : > { %s2085_s22 = scalar_lea.sflag (!%p350_p12), [#allocation6], %s2651_s16  ;;  %s2437_s23 = sshra.s32 (!%p350_p12), %s2100_s17, 4  ;;  %s2438_s23 = int_to_ptr.hbm [resolvable:$true] %s2437_s23 }
  0x3e   : > { %v2201_v32 = vld [vmem:[%s3369_s1 + $0x4] sm:$0xf]  ;;  %vm521_vm0 = vcmask 1043456   ;;  %v486_v33 = vld [vmem:[%s3369_s1] sm:$0xf]  ;;  %vm448_vm1 = vcmask 24576   ;;  %p2444_p2 = scmp.lt.s32.totalorder %s2438_s23, %s3373_s5 }
  0x3f   : > { %2377 = vmatpush.msk.msra.mxu2 %vm521_vm0, %v2201_v32  ;;  %2378 = vmatpush.msk.msra.mxu3 %vm521_vm0, %v486_v33  ;;  %v2220_v34 = vld [vmem:[%s3369_s1 + $0x8] sm:$0xf]  ;;  %vm442_vm2 = vcmask 31744   ;;  %v2487_v35 = vmov 0.0   ;;  %v2230_v36 = vld [vmem:[%s3369_s1 + $0xc] sm:$0xf] }
  0x40   : > { %453 = vst.msk [vmem:[#allocation2 + $0x40] sm:$0x1] %vm448_vm1, %v2487_v35  ;;  %2202 = vmatpush.msk.msra.mxu0 %vm521_vm0, %v2201_v32  ;;  %v386_v37 = vld [vmem:[%s2666_s6 + $0x18] sm:$0xff]  ;;  %2211 = vmatpush.msk.msra.mxu1 %vm521_vm0, %v486_v33  ;;  %v2240_v43 = vld [vmem:[%s3369_s1 + $0x10] sm:$0xf]  ;;  %v387_v46 = vld [vmem:[%s2666_s6 + $0x20] sm:$0xff] }
  0x41   : > { %2221 = vmatpush.msk.msrb.mxu2 %vm521_vm0, %v2220_v34  ;;  %v2180_v38 = vld [vmem:[%s2666_s6 + $0x58] sm:$0xff]  ;;  %443 = vst.msk [vmem:[#allocation2] sm:$0xff] %vm442_vm2, %v2487_v35  ;;  %2231 = vmatpush.msk.msrb.mxu3 %vm521_vm0, %v2230_v36  ;;  %v2181_v47 = vld [vmem:[%s2666_s6 + $0x60] sm:$0xff]  ;;  %v388_v50 = vld [vmem:[%s2666_s6 + $0x28] sm:$0xff]  ;;  %vm1273_vm3 = vcmask 64512   ;;  %vm1279_vm4 = vcmask 57344  }
  0x42   : > { %v2188_v39 = vld [vmem:[%s2666_s6 + $0x98] sm:$0xff]  ;;  %v403_v40 = vmax.f32 %v386_v37, %v2180_v38  ;;  %444 = vst.msk [vmem:[#allocation2 + $0x8] sm:$0xff] %vm442_vm2, %v2487_v35  ;;  %2241 = vmatpush.msk.msrb.mxu0 %vm521_vm0, %v2240_v43  ;;  %v2189_v48 = vld [vmem:[%s2666_s6 + $0xa0] sm:$0xff]  ;;  %v2182_v51 = vld [vmem:[%s2666_s6 + $0x68] sm:$0xff]  ;;  %v404_v63 = vmax.f32 %v387_v46, %v2181_v47  ;;  %s2439_s25 = scalar_lea.hbm %s2438_s23, 64 }
  0x43   : > { %v2196_v41 = vld [vmem:[%s2666_s6 + $0xd8] sm:$0xff]  ;;  %446 = vst.msk [vmem:[#allocation2 + $0x90] sm:$0xff] %vm442_vm2, %v2487_v35  ;;  %v2197_v49 = vld [vmem:[%s2666_s6 + $0xe0] sm:$0xff]  ;;  %v2190_v52 = vld [vmem:[%s2666_s6 + $0xa8] sm:$0xff]  ;;  %v405_v4 = vmax.f32 %v388_v50, %v2182_v51  ;;  %p2440_p13 = scmp.ne.s32.totalorder %s2438_s23, %s2439_s25 }
  0x44   : > { %v429_v42 = vmax.f32 %v2188_v39, %v2196_v41  ;;  %447 = vst.msk [vmem:[#allocation2 + $0x98] sm:$0xff] %vm442_vm2, %v2487_v35  ;;  %v2198_v53 = vld [vmem:[%s2666_s6 + $0xe8] sm:$0xff]  ;;  %v383_v56 = vld [vmem:[%s2666_s6] sm:$0xff]  ;;  %v389_v60 = vld [vmem:[%s2666_s6 + $0x30] sm:$0xff]  ;;  %v430_v0 = vmax.f32 %v2189_v48, %v2197_v49 }
  0x45   : > { %450 = vst.msk [vmem:[#allocation2 + $0x10] sm:$0x1] %vm448_vm1, %v2487_v35  ;;  %v2177_v57 = vld [vmem:[%s2666_s6 + $0x40] sm:$0xff]  ;;  %v2183_v61 = vld [vmem:[%s2666_s6 + $0x70] sm:$0xff]  ;;  %v384_v2 = vld [vmem:[%s2666_s6 + $0x8] sm:$0xff]  ;;  %v431_v5 = vmax.f32 %v2190_v52, %v2198_v53  ;;  %p2441_p0 = pnand %p2440_p13, %p2558_p6 }
  0x46   : > { %v437_v44 = vmax.f32 %v403_v40, %v429_v42  ;;  %451 = vst.msk [vmem:[#allocation2 + $0x20] sm:$0x1] %vm448_vm1, %v2487_v35  ;;  %v2185_v58 = vld [vmem:[%s2666_s6 + $0x80] sm:$0xff]  ;;  %v2191_v62 = vld [vmem:[%s2666_s6 + $0xb0] sm:$0xff]  ;;  %v2178_v3 = vld [vmem:[%s2666_s6 + $0x48] sm:$0xff]  ;;  %v400_v9 = vmax.f32 %v383_v56, %v2177_v57  ;;  %v406_v14 = vmax.f32 %v389_v60, %v2183_v61  ;;  %v438_v16 = vmax.f32 %v404_v63, %v430_v0 }
  0x47   : > { %452 = vst.msk [vmem:[#allocation2 + $0x30] sm:$0x1] %vm448_vm1, %v2487_v35  ;;  %v2193_v59 = vld [vmem:[%s2666_s6 + $0xc0] sm:$0xff]  ;;  %v2199_v1 = vld [vmem:[%s2666_s6 + $0xf0] sm:$0xff]  ;;  %v2186_v6 = vld [vmem:[%s2666_s6 + $0x88] sm:$0xff]  ;;  %v401_v17 = vmax.f32 %v384_v2, %v2178_v3  ;;  %v439_v19 = vmax.f32 %v405_v4, %v431_v5  ;;  %p2442_p1 = pneg %p2441_p0 }
  0x48   : > { %473 = vst.msk [vmem:[#allocation2 + $0x41] sm:$0xff] %vm442_vm2, %v437_v44  ;;  %v2194_v7 = vld [vmem:[%s2666_s6 + $0xc8] sm:$0xff]  ;;  %v385_v8 = vld [vmem:[%s2666_s6 + $0x10] sm:$0xff]  ;;  %v426_v10 = vmax.f32 %v2185_v58, %v2193_v59  ;;  %v432_v15 = vmax.f32 %v2191_v62, %v2199_v1  ;;  %v2260_v25 = vld [vmem:[%s3369_s1 + $0x18] sm:$0xf] }
  0x49   : > { %454 = vst.msk [vmem:[#allocation2 + $0x50] sm:$0x1] %vm448_vm1, %v2487_v35  ;;  %v487_v45 = vld [vmem:[#allocation2 + $0x1] sm:$0xff]  ;;  %v2179_v11 = vld [vmem:[%s2666_s6 + $0x50] sm:$0xff]  ;;  %v427_v18 = vmax.f32 %v2186_v6, %v2194_v7  ;;  %v2270_v26 = vld [vmem:[%s3369_s1 + $0x1c] sm:$0xf] }
  0x4a   : > { %455 = vst.msk [vmem:[#allocation2 + $0x60] sm:$0x1] %vm448_vm1, %v2487_v35  ;;  %2203 = vmatmul.msk.f32.vlgmr.msra.gmra.mxu0 %vm442_vm2, %v487_v45  ;;  %v2187_v12 = vld [vmem:[%s2666_s6 + $0x90] sm:$0xff]  ;;  %v402_v20 = vmax.f32 %v385_v8, %v2179_v11  ;;  %v434_v22 = vmax.f32 %v400_v9, %v426_v10  ;;  %v440_v23 = vmax.f32 %v406_v14, %v432_v15  ;;  %v2280_v31 = vld [vmem:[%s3369_s1 + $0x20] sm:$0xf]  ;;  %v390_v47 = vld [vmem:[%s2666_s6 + $0x38] sm:$0xff] }
  0x4b   : > { %456 = vst.msk [vmem:[#allocation2 + $0x70] sm:$0x1] %vm448_vm1, %v2487_v35  ;;  %v2195_v13 = vld [vmem:[%s2666_s6 + $0xd0] sm:$0xff]  ;;  %v435_v24 = vmax.f32 %v401_v17, %v427_v18  ;;  %2281 = vmatpush.msk.msra.mxu0 %vm521_vm0, %v2280_v31  ;;  %v2184_v48 = vld [vmem:[%s2666_s6 + $0x78] sm:$0xff]  ;;  %v2290_v5 = vld [vmem:[%s3371_s3 + $0x8] sm:$0xff] }
  0x4c   : > { %457 = vst.msk [vmem:[#allocation2 + $0x80] sm:$0x1] %vm448_vm1, %v2487_v35  ;;  %v428_v21 = vmax.f32 %v2187_v12, %v2195_v13  ;;  %v2250_v34 = vld [vmem:[%s3369_s1 + $0x14] sm:$0xf]  ;;  %v2192_v49 = vld [vmem:[%s2666_s6 + $0xb8] sm:$0xff]  ;;  %v407_v50 = vmax.f32 %v390_v47, %v2184_v48 }
  0x4d   : > { %460 = vst.msk [vmem:[#allocation2 + $0x19] sm:$0x1] %vm448_vm1, %v2487_v35  ;;  %2251 = vmatpush.msk.msrb.mxu1 %vm521_vm0, %v2250_v34  ;;  %v2200_v51 = vld [vmem:[%s2666_s6 + $0xf8] sm:$0xff]  ;;  %s2443_s6 = scalar_lea.hbm %s3373_s5, 128 }
  0x4e   : > { %461 = vst.msk [vmem:[#allocation2 + $0x29] sm:$0x1] %vm448_vm1, %v2487_v35  ;;  %v436_v27 = vmax.f32 %v402_v20, %v428_v21  ;;  %v433_v52 = vmax.f32 %v2192_v49, %v2200_v51  ;;  %v1072_v9 = vld [vmem:[#allocation2 + $0x91] sm:$0xff]  ;;  %p2445_p3 = scmp.lt.s32.totalorder %s2443_s6, %s2439_s25 }
  0x4f   : > { %v2712_v54 = vld [vmem:[#allocation2 + $0x41] sm:$0xff]  ;;  %462 = vst.msk [vmem:[#allocation2 + $0x39] sm:$0x1] %vm448_vm1, %v2487_v35 }
  0x50   : > { %v2714_v55 = vld [vmem:[#allocation2 + $0x40] sm:$0xff]  ;;  %2207 = vmatmul.msk.f32.vlgmr.msra.gmra.mxu2 %vm442_vm2, %v2712_v54  ;;  %463 = vst.msk [vmem:[#allocation2 + $0x49] sm:$0x1] %vm448_vm1, %v2487_v35  ;;  %v441_v53 = vmax.f32 %v407_v50, %v433_v52  ;;  %p2446_p4 = por %p2445_p3, %p2444_p2 }
  0x51   : > { %2216 = vmatmul.msk.f32.vlgmr.msra.gmra.mxu3 %vm442_vm2, %v2714_v55  ;;  %464 = vst.msk [vmem:[#allocation2 + $0x59] sm:$0x1] %vm448_vm1, %v2487_v35  ;;  %2261 = vmatpush.msk.msra.mxu2 %vm521_vm0, %v2260_v25  ;;  %v2325_v50 = vld [vmem:[%s3371_s3 + $0x20] sm:$0xff] }
  0x52   : > { %465 = vst.msk [vmem:[#allocation2 + $0x69] sm:$0x1] %vm448_vm1, %v2487_v35  ;;  %2271 = vmatpush.msk.msra.mxu3 %vm521_vm0, %v2270_v26  ;;  %p2447_p5 = pnand %p2446_p4, %p2442_p1 }
  0x53   : > { %466 = vst.msk [vmem:[#allocation2 + $0x79] sm:$0x1] %vm448_vm1, %v2487_v35 }
  0x54   : > { %467 = vst.msk [vmem:[#allocation2 + $0x89] sm:$0x1] %vm448_vm1, %v2487_v35 }
  0x55   : > { %449 = vst.msk [vmem:[#allocation2] sm:$0x1] %vm448_vm1, %v2487_v35 }
  0x56   : > { %458 = vst.msk [vmem:[#allocation2 + $0x90] sm:$0x1] %vm448_vm1, %v2487_v35 }
  0x57   : > { %459 = vst.msk [vmem:[#allocation2 + $0x9] sm:$0x1] %vm448_vm1, %v2487_v35  ;;  %v638_v57 = vld [vmem:[#allocation2 + $0x42] sm:$0xff] }
  0x58   : > { %468 = vst.msk [vmem:[#allocation2 + $0x99] sm:$0x1] %vm448_vm1, %v2487_v35 }
  0x59   : > { %474 = vst.msk [vmem:[#allocation2 + $0x51] sm:$0xff] %vm442_vm2, %v438_v16 }
  0x5a   : > { %475 = vst.msk [vmem:[#allocation2 + $0x61] sm:$0xff] %vm442_vm2, %v439_v19 }
  0x5b   : > { %470 = vst.msk [vmem:[#allocation2 + $0x11] sm:$0xff] %vm442_vm2, %v434_v22 }
  0x5c   : > { %v478_v28 = vld [vmem:[#allocation2] sm:$0xff]  ;;  %476 = vst.msk [vmem:[#allocation2 + $0x71] sm:$0xff] %vm442_vm2, %v440_v23 }
  0x5d   : > { %2212 = vmatmul.msk.f32.vlgmr.msra.gmra.mxu1 %vm442_vm2, %v478_v28  ;;  %471 = vst.msk [vmem:[#allocation2 + $0x21] sm:$0xff] %vm442_vm2, %v435_v24  ;;  %v986_v8 = vld [vmem:[#allocation2 + $0x90] sm:$0xff] }
  0x5e   : > { %472 = vst.msk [vmem:[#allocation2 + $0x31] sm:$0xff] %vm442_vm2, %v436_v27  ;;  %v634_v44 = vld [vmem:[#allocation2 + $0x2] sm:$0xff]  ;;  %1367 = vmatpush.msra.mxu1 %v2290_v5 }
  0x5f   : > { %477 = vst.msk [vmem:[#allocation2 + $0x81] sm:$0xff] %vm442_vm2, %v441_v53  ;;  %v1158_v11 = vld [vmem:[#allocation2 + $0x92] sm:$0xff] }
  0x60   : > { %v2773_v29 = vld [vmem:[#allocation2 + $0x51] sm:$0xff]  ;;  %1274 = vst.msk [vmem:[#allocation3] sm:$0xff] %vm1273_vm3, %v2487_v35 }
  0x61   : > { %v2775_v30 = vld [vmem:[#allocation2 + $0x50] sm:$0xff]  ;;  %2208 = vmatmul.msk.f32.gmra.mxu2 %vm442_vm2, %v2773_v29  ;;  %v2791_v36 = vld [vmem:[#allocation2 + $0x61] sm:$0xff]  ;;  %1275 = vst.msk [vmem:[#allocation3 + $0x8] sm:$0xff] %vm1273_vm3, %v2487_v35 }
  0x62   : > { %2217 = vmatmul.msk.f32.gmra.mxu3 %vm442_vm2, %v2775_v30  ;;  %v488_v32 = vld [vmem:[#allocation2 + $0x11] sm:$0xff]  ;;  %v2793_v37 = vld [vmem:[#allocation2 + $0x60] sm:$0xff]  ;;  %1277 = vst.msk [vmem:[#allocation3 + $0x90] sm:$0xff] %vm1273_vm3, %v2487_v35 }
  0x63   : > { %v479_v33 = vld [vmem:[#allocation2 + $0x10] sm:$0xff]  ;;  %2204 = vmatmul.msk.f32.gmra.mxu0 %vm442_vm2, %v488_v32  ;;  %v640_v59 = vld [vmem:[#allocation2 + $0x62] sm:$0xff]  ;;  %1278 = vst.msk [vmem:[#allocation3 + $0x98] sm:$0xff] %vm1273_vm3, %v2487_v35 }
  0x64   : > { %v2795_v38 = vld [vmem:[#allocation2 + $0x21] sm:$0xff]  ;;  %v2804_v40 = vld [vmem:[#allocation2 + $0x71] sm:$0xff]  ;;  %1280 = vst.msk [vmem:[#allocation3] sm:$0x1] %vm1279_vm4, %v2487_v35 }
  0x65   : > { %2213 = vmatmul.msk.f32.gmra.mxu1 %vm442_vm2, %v479_v33  ;;  %v480_v39 = vld [vmem:[#allocation2 + $0x20] sm:$0xff]  ;;  %v2806_v41 = vld [vmem:[#allocation2 + $0x70] sm:$0xff]  ;;  %1281 = vst.msk [vmem:[#allocation3 + $0x10] sm:$0x1] %vm1279_vm4, %v2487_v35 }
  0x66   : > { %v490_v42 = vld [vmem:[#allocation2 + $0x31] sm:$0xff]  ;;  %v636_v46 = vld [vmem:[#allocation2 + $0x22] sm:$0xff]  ;;  %1282 = vst.msk [vmem:[#allocation3 + $0x20] sm:$0x1] %vm1279_vm4, %v2487_v35 }
  0x67   : > { %v481_v43 = vld [vmem:[#allocation2 + $0x30] sm:$0xff]  ;;  %v727_v61 = vld [vmem:[#allocation2 + $0x80] sm:$0xff]  ;;  %1283 = vst.msk [vmem:[#allocation3 + $0x30] sm:$0x1] %vm1279_vm4, %v2487_v35 }
  0x68   : > { %v635_v45 = vld [vmem:[#allocation2 + $0x12] sm:$0xff]  ;;  %v813_v62 = vld [vmem:[#allocation2 + $0x81] sm:$0xff]  ;;  %1284 = vst.msk [vmem:[#allocation3 + $0x40] sm:$0x1] %vm1279_vm4, %v2487_v35 }
  0x69   : > { %2209 = vmatmul.msk.f32.gmra.mxu2 %vm442_vm2, %v2791_v36  ;;  %v637_v56 = vld [vmem:[#allocation2 + $0x32] sm:$0xff]  ;;  %v899_v63 = vld [vmem:[#allocation2 + $0x82] sm:$0xff]  ;;  %1285 = vst.msk [vmem:[#allocation3 + $0x50] sm:$0x1] %vm1279_vm4, %v2487_v35 }
  0x6a   : > { %2218 = vmatmul.msk.f32.gmra.mxu3 %vm442_vm2, %v2793_v37  ;;  %v639_v58 = vld [vmem:[#allocation2 + $0x52] sm:$0xff]  ;;  %1286 = vst.msk [vmem:[#allocation3 + $0x60] sm:$0x1] %vm1279_vm4, %v2487_v35 }
  0x6b   : > { %2205 = vmatmul.msk.f32.gmra.mxu0 %vm442_vm2, %v2795_v38  ;;  %v641_v60 = vld [vmem:[#allocation2 + $0x72] sm:$0xff]  ;;  %1287 = vst.msk [vmem:[#allocation3 + $0x70] sm:$0x1] %vm1279_vm4, %v2487_v35 }
  0x6c   : > { %1288 = vst.msk [vmem:[#allocation3 + $0x80] sm:$0x1] %vm1279_vm4, %v2487_v35 }
  0x6d   : > { %2214 = vmatmul.msk.f32.gmra.mxu1 %vm442_vm2, %v480_v39  ;;  %1289 = vst.msk [vmem:[#allocation3 + $0x90] sm:$0x1] %vm1279_vm4, %v2487_v35 }
  0x6e   : > { %1290 = vst.msk [vmem:[#allocation3 + $0x9] sm:$0x1] %vm1279_vm4, %v2487_v35 }
  0x6f   : > { %1291 = vst.msk [vmem:[#allocation3 + $0x19] sm:$0x1] %vm1279_vm4, %v2487_v35 }
  0x70   : > { %1292 = vst.msk [vmem:[#allocation3 + $0x29] sm:$0x1] %vm1279_vm4, %v2487_v35 }
  0x71   : > { %2210 = vmatmul.msk.f32.gmra.mxu2 %vm442_vm2, %v2804_v40  ;;  %1293 = vst.msk [vmem:[#allocation3 + $0x39] sm:$0x1] %vm1279_vm4, %v2487_v35 }
  0x72   : > { %2219 = vmatmul.msk.f32.gmra.mxu3 %vm442_vm2, %v2806_v41  ;;  %1294 = vst.msk [vmem:[#allocation3 + $0x49] sm:$0x1] %vm1279_vm4, %v2487_v35 }
  0x73   : > { %2206 = vmatmul.msk.f32.gmra.mxu0 %vm442_vm2, %v490_v42  ;;  %1295 = vst.msk [vmem:[#allocation3 + $0x59] sm:$0x1] %vm1279_vm4, %v2487_v35 }
  0x74   : > { %1296 = vst.msk [vmem:[#allocation3 + $0x69] sm:$0x1] %vm1279_vm4, %v2487_v35 }
  0x75   : > { %2215 = vmatmul.msk.f32.gmra.mxu1 %vm442_vm2, %v481_v43  ;;  %1297 = vst.msk [vmem:[#allocation3 + $0x79] sm:$0x1] %vm1279_vm4, %v2487_v35  ;;  %v1458_v47 = vld [vmem:[#allocation3 + $0x2] sm:$0xff] }
  0x76   : > { %1298 = vst.msk [vmem:[#allocation3 + $0x89] sm:$0x1] %vm1279_vm4, %v2487_v35 }
  0x77   : > { %1299 = vst.msk [vmem:[#allocation3 + $0x99] sm:$0x1] %vm1279_vm4, %v2487_v35 }
  0x79   : > { %2222 = vmatmul.msk.f32.vlgmr.msrb.gmra.mxu2 %vm442_vm2, %v634_v44 }
  0x7a   : > { %2232 = vmatmul.msk.f32.vlgmr.msrb.gmra.mxu3 %vm442_vm2, %v479_v33  ;;  %v2307_v33 = vld [vmem:[%s3371_s3 + $0x10] sm:$0xff] }
  0x7b   : > { %2242 = vmatmul.msk.f32.vlgmr.msrb.gmra.mxu0 %vm442_vm2, %v488_v32  ;;  %v1317_v32 = vld [vmem:[%s3371_s3] sm:$0xff]  ;;  %1507 = vmatpush.msrb.mxu3 %v2307_v33 }
  0x7c   : > { %1432 = vmatpush.msrb.mxu2 %v1317_v32 }
  0x7d   : > { %2252 = vmatmul.msk.f32.vlgmr.msrb.gmra.mxu1 %vm442_vm2, %v635_v45 }
  0x7e   : > { %1673 = vmatpush.msrb.mxu1 %v2325_v50 }
  0x81   : > { %2223 = vmatmul.msk.f32.gmra.mxu2 %vm442_vm2, %v635_v45 }
  0x82   : > { %2233 = vmatmul.msk.f32.gmra.mxu3 %vm442_vm2, %v480_v39 }
  0x83   : > { %2243 = vmatmul.msk.f32.gmra.mxu0 %vm442_vm2, %v2795_v38 }
  0x85   : > { %2253 = vmatmul.msk.f32.gmra.mxu1 %vm442_vm2, %v636_v46 }
  0x89   : > { %2224 = vmatmul.msk.f32.gmra.mxu2 %vm442_vm2, %v636_v46 }
  0x8a   : > { %2234 = vmatmul.msk.f32.gmra.mxu3 %vm442_vm2, %v481_v43 }
  0x8b   : > { %2244 = vmatmul.msk.f32.gmra.mxu0 %vm442_vm2, %v490_v42 }
  0x8d   : > { %2254 = vmatmul.msk.f32.gmra.mxu1 %vm442_vm2, %v637_v56 }
  0x91   : > { %2225 = vmatmul.msk.f32.gmra.mxu2 %vm442_vm2, %v637_v56 }
  0x92   : > { %2235 = vmatmul.msk.f32.gmra.mxu3 %vm442_vm2, %v2714_v55 }
  0x93   : > { %2245 = vmatmul.msk.f32.gmra.mxu0 %vm442_vm2, %v2712_v54 }
  0x95   : > { %2255 = vmatmul.msk.f32.gmra.mxu1 %vm442_vm2, %v638_v57 }
  0x99   : > { %2226 = vmatmul.msk.f32.gmra.mxu2 %vm442_vm2, %v638_v57 }
  0x9a   : > { %2236 = vmatmul.msk.f32.gmra.mxu3 %vm442_vm2, %v2775_v30 }
  0x9b   : > { %2246 = vmatmul.msk.f32.gmra.mxu0 %vm442_vm2, %v2773_v29 }
  0x9d   : > { %2256 = vmatmul.msk.f32.gmra.mxu1 %vm442_vm2, %v639_v58 }
  0xa1   : > { %2227 = vmatmul.msk.f32.gmra.mxu2 %vm442_vm2, %v639_v58 }
  0xa2   : > { %2237 = vmatmul.msk.f32.gmra.mxu3 %vm442_vm2, %v2793_v37 }
  0xa3   : > { %2247 = vmatmul.msk.f32.gmra.mxu0 %vm442_vm2, %v2791_v36 }
  0xa5   : > { %2257 = vmatmul.msk.f32.gmra.mxu1 %vm442_vm2, %v640_v59 }
  0xa9   : > { %2228 = vmatmul.msk.f32.gmra.mxu2 %vm442_vm2, %v640_v59 }
  0xaa   : > { %2238 = vmatmul.msk.f32.gmra.mxu3 %vm442_vm2, %v2806_v41 }
  0xab   : > { %2248 = vmatmul.msk.f32.gmra.mxu0 %vm442_vm2, %v2804_v40 }
  0xad   : > { %2258 = vmatmul.msk.f32.gmra.mxu1 %vm442_vm2, %v641_v60 }
  0xb1   : > { %2229 = vmatmul.msk.f32.gmra.mxu2 %vm442_vm2, %v641_v60 }
  0xb2   : > { %2239 = vmatmul.msk.f32.gmra.mxu3 %vm442_vm2, %v727_v61 }
  0xb3   : > { %2249 = vmatmul.msk.f32.gmra.mxu0 %vm442_vm2, %v813_v62 }
  0xb5   : > { %2259 = vmatmul.msk.f32.gmra.mxu1 %vm442_vm2, %v899_v63 }
  0xb9   : > { %2262 = vmatmul.msk.f32.vlgmr.msra.gmra.mxu2 %vm442_vm2, %v480_v39  ;;  %v1309_v39 = vld [vmem:[#allocation3] sm:$0xff] }
  0xba   : > { %2272 = vmatmul.msk.f32.vlgmr.msra.gmra.mxu3 %vm442_vm2, %v2795_v38 }
  0xbb   : > { %2282 = vmatmul.msk.f32.vlgmr.msra.gmra.mxu0 %vm442_vm2, %v636_v46 }
  0xc1   : > { %2263 = vmatmul.msk.f32.gmra.mxu2 %vm442_vm2, %v481_v43 }
  0xc2   : > { %2273 = vmatmul.msk.f32.gmra.mxu3 %vm442_vm2, %v490_v42  ;;  %v2316_v42 = vld [vmem:[%s3371_s3 + $0x18] sm:$0xff] }
  0xc3   : > { %2283 = vmatmul.msk.f32.gmra.mxu0 %vm442_vm2, %v637_v56 }
  0xc4   : > { %1590 = vmatpush.msrb.mxu0 %v2316_v42 }
  0xc7   : > { %v2877_v0 = vpop.f32.mrf.mxu0 }
  0xc9   : > { %2264 = vmatmul.msk.f32.gmra.mxu2 %vm442_vm2, %v2714_v55 }
  0xca   : > { %2274 = vmatmul.msk.f32.gmra.mxu3 %vm442_vm2, %v2712_v54 }
  0xcb   : > { %2284 = vmatmul.msk.f32.gmra.mxu0 %vm442_vm2, %v638_v57 }
  0xd1   : > { %2265 = vmatmul.msk.f32.gmra.mxu2 %vm442_vm2, %v2775_v30 }
  0xd2   : > { %2275 = vmatmul.msk.f32.gmra.mxu3 %vm442_vm2, %v2773_v29 }
  0xd3   : > { %2285 = vmatmul.msk.f32.gmra.mxu0 %vm442_vm2, %v639_v58  ;;  %v2883_v55 = vpop.f32.mrf.mxu2 }
  0xd4   : > { %v2885_v54 = vpop.f32.mrf.mxu3 }
  0xd5   : > { %v623_v50 = vadd.f32 %v2885_v54, %v2883_v55 }
  0xd9   : > { %2266 = vmatmul.msk.f32.gmra.mxu2 %vm442_vm2, %v2793_v37 }
  0xda   : > { %2276 = vmatmul.msk.f32.gmra.mxu3 %vm442_vm2, %v2791_v36  ;;  %v610_v18 = vpop.f32.mrf.mxu1 }
  0xdb   : > { %2286 = vmatmul.msk.f32.gmra.mxu0 %vm442_vm2, %v640_v59  ;;  %v611_v46 = vadd.f32 %v610_v18, %v2877_v0 }
  0xe0   : > { %v2888_v1 = vpop.f32.mrf.mxu0 }
  0xe1   : > { %2267 = vmatmul.msk.f32.gmra.mxu2 %vm442_vm2, %v2806_v41 }
  0xe2   : > { %2277 = vmatmul.msk.f32.gmra.mxu3 %vm442_vm2, %v2804_v40  ;;  %v2936_v24 = vpop.f32.mrf.mxu1  ;;  %v1318_v40 = vld [vmem:[#allocation3 + $0x1] sm:$0xff] }
  0xe3   : > { %2287 = vmatmul.msk.f32.gmra.mxu0 %vm442_vm2, %v641_v60  ;;  %2291 = vmatmul.msk.f32.vlgmr.msra.gmra.mxu1 %vm1273_vm3, %v1318_v40  ;;  %v614_v57 = vadd.f32 %v2936_v24, %v2888_v1 }
  0xe4   : > { %v2895_v2 = vpop.f32.mrf.mxu2 }
  0xe5   : > { %v2897_v3 = vpop.f32.mrf.mxu3 }
  0xe8   : > { %v2899_v4 = vpop.f32.mrf.mxu0 }
  0xe9   : > { %2268 = vmatmul.msk.f32.gmra.mxu2 %vm442_vm2, %v727_v61 }
  0xea   : > { %2278 = vmatmul.msk.f32.gmra.mxu3 %vm442_vm2, %v813_v62  ;;  %v2944_v28 = vpop.f32.mrf.mxu1 }
  0xeb   : > { %2288 = vmatmul.msk.f32.gmra.mxu0 %vm442_vm2, %v899_v63  ;;  %v617_v0 = vadd.f32 %v2944_v28, %v2899_v4 }
  0xec   : > { %v2907_v6 = vpop.f32.mrf.mxu2 }
  0xed   : > { %v2909_v7 = vpop.f32.mrf.mxu3 }
  0xf0   : > { %v2911_v10 = vpop.f32.mrf.mxu0 }
  0xf1   : > { %2269 = vmatmul.msk.f32.gmra.mxu2 %vm442_vm2, %v986_v8 }
  0xf2   : > { %2279 = vmatmul.msk.f32.gmra.mxu3 %vm442_vm2, %v1072_v9  ;;  %v619_v36 = vpop.f32.mrf.mxu1 }
  0xf3   : > { %2289 = vmatmul.msk.f32.gmra.mxu0 %vm442_vm2, %v1158_v11  ;;  %v620_v28 = vadd.f32 %v619_v36, %v2911_v10 }
  0xf4   : > { %v2916_v12 = vpop.f32.mrf.mxu2 }
  0xf5   : > { %v2918_v13 = vpop.f32.mrf.mxu3 }
  0xf8   : > { %v2920_v14 = vpop.f32.mrf.mxu0 }
  0xf9   : > { %2299 = vmatmul.msk.f32.vlgmr.msrb.gmra.mxu2 %vm1273_vm3, %v1309_v39 }
  0xfa   : > { %v946_v43 = vpop.f32.mrf.mxu1  ;;  %2308 = vmatmul.msk.f32.vlgmr.msrb.gmra.mxu3 %vm1273_vm3, %v1458_v47 }
  0xfc   : > { %v688_v15 = vpop.f32.mrf.mxu2 }
  0xfd   : > { %v2922_v16 = vpop.f32.mrf.mxu3  ;;  %v712_v48 = vadd.f32 %v688_v15, %v611_v46 }
  0xff   : > { %v798_v51 = vadd.f32 %v2922_v16, %v712_v48 }
 0x100   : > { %v2924_v17 = vpop.f32.mrf.mxu0 }
 0x101   : > { %v884_v58 = vadd.f32 %v2920_v14, %v798_v51  ;;  %v3047_v14 = vld [vmem:[%s3370_s2] ss:$0 sm:$0xff] }
 0x102   : > { %v949_v52 = vpop.f32.mrf.mxu1 }
 0x103   : > { %v970_v60 = vadd.f32 %v946_v43, %v884_v58 }
 0x104   : > { %v2926_v19 = vpop.f32.mrf.mxu2 }
 0x105   : > { %v2928_v20 = vpop.f32.mrf.mxu3  ;;  %v713_v59 = vadd.f32 %v2926_v19, %v614_v57 }
 0x107   : > { %v799_v61 = vadd.f32 %v2928_v20, %v713_v59 }
 0x108   : > { %v2930_v21 = vpop.f32.mrf.mxu0 }
 0x109   : > { %v885_v9 = vadd.f32 %v2924_v17, %v799_v61 }
 0x10a   : > { %v952_v5 = vpop.f32.mrf.mxu1 }
 0x10b   : > { %v971_v18 = vadd.f32 %v949_v52, %v885_v9 }
 0x10c   : > { %v2932_v22 = vpop.f32.mrf.mxu2 }
 0x10d   : > { %v2934_v23 = vpop.f32.mrf.mxu3  ;;  %v714_v11 = vadd.f32 %v2932_v22, %v617_v0  ;;  %v626_v0 = vadd.f32 %v2897_v3, %v2895_v2 }
 0x10f   : > { %v800_v19 = vadd.f32 %v2934_v23, %v714_v11 }
 0x110   : > { %v2938_v25 = vpop.f32.mrf.mxu0 }
 0x111   : > { %v886_v32 = vadd.f32 %v2930_v21, %v800_v19 }
 0x112   : > { %v955_v39 = vpop.f32.mrf.mxu1 }
 0x113   : > { %v972_v46 = vadd.f32 %v952_v5, %v886_v32 }
 0x114   : > { %v2940_v26 = vpop.f32.mrf.mxu2 }
 0x115   : > { %v2942_v27 = vpop.f32.mrf.mxu3  ;;  %v715_v33 = vadd.f32 %v2940_v26, %v620_v28  ;;  %v629_v28 = vadd.f32 %v2909_v7, %v2907_v6  ;;  %v2334_v6 = vld [vmem:[%s3371_s3 + $0x28] sm:$0xff]  ;;  %v2343_v7 = vld [vmem:[%s3371_s3 + $0x30] sm:$0xff] }
 0x116   : > { %1756 = vmatpush.msra.mxu2 %v2334_v6  ;;  %1840 = vmatpush.msra.mxu3 %v2343_v7 }
 0x117   : > { %v801_v47 = vadd.f32 %v2942_v27, %v715_v33 }
 0x118   : > { %v2946_v29 = vpop.f32.mrf.mxu0 }
 0x119   : > { %v887_v51 = vadd.f32 %v2938_v25, %v801_v47 }
 0x11a   : > { %v958_v54 = vpop.f32.mrf.mxu1 }
 0x11b   : > { %v973_v25 = vadd.f32 %v955_v39, %v887_v51 }
 0x11c   : > { %v2954_v30 = vpop.f32.mrf.mxu2 }
 0x11d   : > { %v2956_v31 = vpop.f32.mrf.mxu3  ;;  %v716_v52 = vadd.f32 %v2954_v30, %v623_v50  ;;  %v632_v50 = vadd.f32 %v2918_v13, %v2916_v12  ;;  %v2361_v13 = vld [vmem:[%s3371_s3 + $0x40] sm:$0xff] }
 0x11e   : > { %2006 = vmatpush.msra.mxu1 %v2361_v13 }
 0x11f   : > { %v802_v30 = vadd.f32 %v2956_v31, %v716_v52 }
 0x120   : > { %v2972_v34 = vpop.f32.mrf.mxu0 }
 0x121   : > { %v888_v9 = vadd.f32 %v2946_v29, %v802_v30 }
 0x122   : > { %v961_v19 = vpop.f32.mrf.mxu1 }
 0x123   : > { %v974_v29 = vadd.f32 %v958_v54, %v888_v9 }
 0x124   : > { %v2982_v37 = vpop.f32.mrf.mxu2 }
 0x125   : > { %v2984_v38 = vpop.f32.mrf.mxu3  ;;  %v717_v11 = vadd.f32 %v2982_v37, %v626_v0 }
 0x127   : > { %v803_v37 = vadd.f32 %v2984_v38, %v717_v11 }
 0x128   : > { %v2995_v41 = vpop.f32.mrf.mxu0 }
 0x129   : > { %v889_v32 = vadd.f32 %v2972_v34, %v803_v37 }
 0x12a   : > { %v964_v51 = vpop.f32.mrf.mxu1 }
 0x12c   : > { %v3009_v44 = vpop.f32.mrf.mxu2 }
 0x12d   : > { %v3011_v45 = vpop.f32.mrf.mxu3  ;;  %v718_v33 = vadd.f32 %v3009_v44, %v629_v28 }
 0x12f   : > { %v804_v47 = vadd.f32 %v3011_v45, %v718_v33 }
 0x130   : > { %v3023_v49 = vpop.f32.mrf.mxu0 }
 0x131   : > { %v890_v52 = vadd.f32 %v2995_v41, %v804_v47 }
 0x133   : > { %v976_v41 = vadd.f32 %v964_v51, %v890_v52 }
 0x134   : > { %v3031_v53 = vpop.f32.mrf.mxu2 }
 0x135   : > { %v3033_v56 = vpop.f32.mrf.mxu3 }
 0x138   : > { %v1205_v35 = vpop.f32.mrf.mxu0 }
 0x13c   : > { %v1033_v62 = vpop.f32.mrf.mxu2 }
 0x13d   : > { %v1119_v63 = vpop.f32.mrf.mxu3  ;;  %v1057_v8 = vadd.f32 %v1033_v62, %v970_v60 }
 0x13f   : > { %v1143_v1 = vadd.f32 %v1119_v63, %v1057_v8 }
 0x140   : > { %v1208_v15 = vpop.f32.mrf.mxu0 }
 0x141   : > { %v1229_v16 = vadd.f32 %v1205_v35, %v1143_v1 }
 0x143   : > { %v1241_v20 = vadd.f32 %v3047_v14, %v1229_v16 }
 0x144   : > { %v1036_v4 = vpop.f32.mrf.mxu2 }
 0x145   : > { %v1122_v24 = vpop.f32.mrf.mxu3  ;;  %vm1249_vm5 = vcmp.gt.f32.partialorder %v1241_v20, 0.0  ;;  %v1257_v17 = vmul.f32 0.01, %v1241_v20  ;;  %v1058_v22 = vadd.f32 %v1036_v4, %v971_v18 }
 0x147   : > { %v1265_v40 = vsel %vm1249_vm5, %v1241_v20, %v1257_v17  ;;  %v1144_v42 = vadd.f32 %v1122_v24, %v1058_v22 }
 0x148   : > { %1301 = vst.msk [vmem:[#allocation3 + $0x11] sm:$0xff] %vm1273_vm3, %v1265_v40  ;;  %v1211_v43 = vpop.f32.mrf.mxu0 }
 0x149   : > { %v1230_v23 = vadd.f32 %v1208_v15, %v1144_v42 }
 0x14b   : > { %v1242_v48 = vadd.f32 %v3047_v14, %v1230_v23  ;;  %v2352_v23 = vld [vmem:[%s3371_s3 + $0x38] sm:$0xff] }
 0x14c   : > { %v1039_v10 = vpop.f32.mrf.mxu2  ;;  %1923 = vmatpush.msra.mxu0 %v2352_v23 }
 0x14d   : > { %v1125_v36 = vpop.f32.mrf.mxu3  ;;  %vm1250_vm6 = vcmp.gt.f32.partialorder %v1242_v48, 0.0  ;;  %v1258_v21 = vmul.f32 0.01, %v1242_v48  ;;  %v1059_v26 = vadd.f32 %v1039_v10, %v972_v46  ;;  %v975_v46 = vadd.f32 %v961_v19, %v889_v32 }
 0x14f   : > { %v1266_v57 = vsel %vm1250_vm6, %v1242_v48, %v1258_v21  ;;  %v1145_v58 = vadd.f32 %v1125_v36, %v1059_v26  ;;  %v3061_v59 = vld [vmem:[#allocation3 + $0x11] sm:$0xff] }
 0x150   : > { %v1310_v35 = vld [vmem:[#allocation3 + $0x10] sm:$0xff]  ;;  %1302 = vst.msk [vmem:[#allocation3 + $0x21] sm:$0xff] %vm1273_vm3, %v1266_v57  ;;  %2292 = vmatmul.msk.f32.gmra.mxu1 %vm1273_vm3, %v3061_v59  ;;  %v1214_v55 = vpop.f32.mrf.mxu0  ;;  %v719_v57 = vadd.f32 %v3031_v53, %v632_v50 }
 0x151   : > { %v3063_v27 = vld [vmem:[#allocation3 + $0x12] sm:$0xff]  ;;  %2300 = vmatmul.msk.f32.gmra.mxu2 %vm1273_vm3, %v1310_v35  ;;  %v1231_v60 = vadd.f32 %v1211_v43, %v1145_v58  ;;  %2317 = vmatmul.msk.f32.vlgmr.msrb.gmra.mxu0 %vm1273_vm3, %v1310_v35 }
 0x152   : > { %2309 = vmatmul.msk.f32.gmra.mxu3 %vm1273_vm3, %v3063_v27  ;;  %v805_v53 = vadd.f32 %v3033_v56, %v719_v57 }
 0x153   : > { %v1243_v61 = vadd.f32 %v3047_v14, %v1231_v60 }
 0x154   : > { %v1042_v62 = vpop.f32.mrf.mxu2  ;;  %v891_v0 = vadd.f32 %v3023_v49, %v805_v53 }
 0x155   : > { %v1128_v63 = vpop.f32.mrf.mxu3  ;;  %vm1251_vm7 = vcmp.gt.f32.partialorder %v1243_v61, 0.0  ;;  %v1259_v5 = vmul.f32 0.01, %v1243_v61  ;;  %v1060_v8 = vadd.f32 %v1042_v62, %v973_v25 }
 0x157   : > { %v1267_v1 = vsel %vm1251_vm7, %v1243_v61, %v1259_v5  ;;  %v1146_v15 = vadd.f32 %v1128_v63, %v1060_v8  ;;  %v3078_v16 = vld [vmem:[#allocation3 + $0x21] sm:$0xff] }
 0x158   : > { %v3080_v18 = vld [vmem:[#allocation3 + $0x20] sm:$0xff]  ;;  %1303 = vst.msk [vmem:[#allocation3 + $0x31] sm:$0xff] %vm1273_vm3, %v1267_v1  ;;  %2293 = vmatmul.msk.f32.gmra.mxu1 %vm1273_vm3, %v3078_v16  ;;  %v1217_v2 = vpop.f32.mrf.mxu0 }
 0x159   : > { %v3082_v31 = vld [vmem:[#allocation3 + $0x22] sm:$0xff]  ;;  %2301 = vmatmul.msk.f32.gmra.mxu2 %vm1273_vm3, %v3080_v18  ;;  %v1232_v3 = vadd.f32 %v1214_v55, %v1146_v15  ;;  %2318 = vmatmul.msk.f32.gmra.mxu0 %vm1273_vm3, %v3080_v18  ;;  %v967_v15 = vpop.f32.mrf.mxu1 }
 0x15a   : > { %2310 = vmatmul.msk.f32.gmra.mxu3 %vm1273_vm3, %v3082_v31  ;;  %v977_v49 = vadd.f32 %v967_v15, %v891_v0 }
 0x15b   : > { %v1244_v20 = vadd.f32 %v3047_v14, %v1232_v3 }
 0x15c   : > { %v1045_v4 = vpop.f32.mrf.mxu2 }
 0x15d   : > { %v1131_v24 = vpop.f32.mrf.mxu3  ;;  %vm1252_vm8 = vcmp.gt.f32.partialorder %v1244_v20, 0.0  ;;  %v1260_v17 = vmul.f32 0.01, %v1244_v20  ;;  %v1061_v22 = vadd.f32 %v1045_v4, %v974_v29 }
 0x15f   : > { %v1268_v39 = vsel %vm1252_vm8, %v1244_v20, %v1260_v17  ;;  %v1147_v40 = vadd.f32 %v1131_v24, %v1061_v22  ;;  %v3099_v42 = vld [vmem:[#allocation3 + $0x31] sm:$0xff] }
 0x160   : > { %v3101_v38 = vld [vmem:[#allocation3 + $0x30] sm:$0xff]  ;;  %1304 = vst.msk [vmem:[#allocation3 + $0x41] sm:$0xff] %vm1273_vm3, %v1268_v39  ;;  %2294 = vmatmul.msk.f32.gmra.mxu1 %vm1273_vm3, %v3099_v42  ;;  %v1220_v44 = vpop.f32.mrf.mxu0 }
 0x161   : > { %v3103_v43 = vld [vmem:[#allocation3 + $0x32] sm:$0xff]  ;;  %2302 = vmatmul.msk.f32.gmra.mxu2 %vm1273_vm3, %v3101_v38  ;;  %v1233_v34 = vadd.f32 %v1217_v2, %v1147_v40  ;;  %2319 = vmatmul.msk.f32.gmra.mxu0 %vm1273_vm3, %v3101_v38 }
 0x162   : > { %2311 = vmatmul.msk.f32.gmra.mxu3 %vm1273_vm3, %v3103_v43 }
 0x163   : > { %v1245_v48 = vadd.f32 %v3047_v14, %v1233_v34 }
 0x164   : > { %v1048_v10 = vpop.f32.mrf.mxu2 }
 0x165   : > { %v1134_v36 = vpop.f32.mrf.mxu3  ;;  %vm1253_vm9 = vcmp.gt.f32.partialorder %v1245_v48, 0.0  ;;  %v1261_v21 = vmul.f32 0.01, %v1245_v48  ;;  %v1062_v26 = vadd.f32 %v1048_v10, %v975_v46 }
 0x167   : > { %v1269_v58 = vsel %vm1253_vm9, %v1245_v48, %v1261_v21  ;;  %v1148_v35 = vadd.f32 %v1134_v36, %v1062_v26  ;;  %v3129_v55 = vld [vmem:[#allocation3 + $0x41] sm:$0xff] }
 0x168   : > { %v3131_v45 = vld [vmem:[#allocation3 + $0x40] sm:$0xff]  ;;  %1305 = vst.msk [vmem:[#allocation3 + $0x51] sm:$0xff] %vm1273_vm3, %v1269_v58  ;;  %2295 = vmatmul.msk.f32.gmra.mxu1 %vm1273_vm3, %v3129_v55  ;;  %v1223_v25 = vpop.f32.mrf.mxu0 }
 0x169   : > { %v3133_v54 = vld [vmem:[#allocation3 + $0x42] sm:$0xff]  ;;  %2303 = vmatmul.msk.f32.gmra.mxu2 %vm1273_vm3, %v3131_v45  ;;  %v1234_v12 = vadd.f32 %v1220_v44, %v1148_v35  ;;  %2320 = vmatmul.msk.f32.gmra.mxu0 %vm1273_vm3, %v3131_v45  ;;  %v1964_v35 = vld [vmem:[#allocation3 + $0x92] sm:$0xff] }
 0x16a   : > { %2312 = vmatmul.msk.f32.gmra.mxu3 %vm1273_vm3, %v3133_v54 }
 0x16b   : > { %v1246_v60 = vadd.f32 %v3047_v14, %v1234_v12 }
 0x16c   : > { %v1051_v30 = vpop.f32.mrf.mxu2 }
 0x16d   : > { %v1137_v61 = vpop.f32.mrf.mxu3  ;;  %vm1254_vm10 = vcmp.gt.f32.partialorder %v1246_v60, 0.0  ;;  %v1262_v62 = vmul.f32 0.01, %v1246_v60  ;;  %v1063_v63 = vadd.f32 %v1051_v30, %v976_v41 }
 0x16f   : > { %v1270_v5 = vsel %vm1254_vm10, %v1246_v60, %v1262_v62  ;;  %v1149_v8 = vadd.f32 %v1137_v61, %v1063_v63  ;;  %v1323_v9 = vld [vmem:[#allocation3 + $0x51] sm:$0xff] }
 0x170   : > { %v1314_v11 = vld [vmem:[#allocation3 + $0x50] sm:$0xff]  ;;  %1306 = vst.msk [vmem:[#allocation3 + $0x61] sm:$0xff] %vm1273_vm3, %v1270_v5  ;;  %2296 = vmatmul.msk.f32.gmra.mxu1 %vm1273_vm3, %v1323_v9  ;;  %v1226_v20 = vpop.f32.mrf.mxu0 }
 0x171   : > { %v3150_v1 = vld [vmem:[#allocation3 + $0x52] sm:$0xff]  ;;  %2304 = vmatmul.msk.f32.gmra.mxu2 %vm1273_vm3, %v1314_v11  ;;  %v1235_v56 = vadd.f32 %v1223_v25, %v1149_v8  ;;  %2321 = vmatmul.msk.f32.gmra.mxu0 %vm1273_vm3, %v1314_v11 }
 0x172   : > { %2313 = vmatmul.msk.f32.gmra.mxu3 %vm1273_vm3, %v3150_v1 }
 0x173   : > { %v1247_v2 = vadd.f32 %v3047_v14, %v1235_v56 }
 0x174   : > { %v1054_v3 = vpop.f32.mrf.mxu2 }
 0x175   : > { %v1140_v29 = vpop.f32.mrf.mxu3  ;;  %vm1255_vm11 = vcmp.gt.f32.partialorder %v1247_v2, 0.0  ;;  %v1263_v37 = vmul.f32 0.01, %v1247_v2  ;;  %v1064_v19 = vadd.f32 %v1054_v3, %v977_v49 }
 0x177   : > { %v1271_v4 = vsel %vm1255_vm11, %v1247_v2, %v1263_v37  ;;  %v1150_v24 = vadd.f32 %v1140_v29, %v1064_v19  ;;  %v1324_v28 = vld [vmem:[#allocation3 + $0x61] sm:$0xff] }
 0x178   : > { %v1315_v17 = vld [vmem:[#allocation3 + $0x60] sm:$0xff]  ;;  %1307 = vst.msk [vmem:[#allocation3 + $0x71] sm:$0xff] %vm1273_vm3, %v1271_v4  ;;  %2297 = vmatmul.msk.f32.gmra.mxu1 %vm1273_vm3, %v1324_v28 }
 0x179   : > { %v3159_v22 = vld [vmem:[#allocation3 + $0x62] sm:$0xff]  ;;  %2305 = vmatmul.msk.f32.gmra.mxu2 %vm1273_vm3, %v1315_v17  ;;  %v1236_v32 = vadd.f32 %v1226_v20, %v1150_v24  ;;  %2322 = vmatmul.msk.f32.gmra.mxu0 %vm1273_vm3, %v1315_v17 }
 0x17a   : > { %2314 = vmatmul.msk.f32.gmra.mxu3 %vm1273_vm3, %v3159_v22 }
 0x17b   : > { %v1248_v33 = vadd.f32 %v3047_v14, %v1236_v32  ;;  %v1798_v14 = vld [vmem:[#allocation3 + $0x90] sm:$0xff] }
 0x17c   : > { %v1434_v23 = vpop.f32.mrf.mxu2 }
 0x17d   : > { %vm1256_vm12 = vcmp.gt.f32.partialorder %v1248_v33, 0.0  ;;  %v1264_v39 = vmul.f32 0.01, %v1248_v33  ;;  %v1509_v47 = vpop.f32.mrf.mxu3 }
 0x17f   : > { %v1272_v40 = vsel %vm1256_vm12, %v1248_v33, %v1264_v39  ;;  %v1325_v6 = vld [vmem:[#allocation3 + $0x71] sm:$0xff] }
 0x180   : > { %v1316_v7 = vld [vmem:[#allocation3 + $0x70] sm:$0xff]  ;;  %1308 = vst.msk [vmem:[#allocation3 + $0x81] sm:$0xff] %vm1273_vm3, %v1272_v40  ;;  %2298 = vmatmul.msk.f32.gmra.mxu1 %vm1273_vm3, %v1325_v6 }
 0x181   : > { %v1465_v34 = vld [vmem:[#allocation3 + $0x72] sm:$0xff]  ;;  %2306 = vmatmul.msk.f32.gmra.mxu2 %vm1273_vm3, %v1316_v7  ;;  %2323 = vmatmul.msk.f32.gmra.mxu0 %vm1273_vm3, %v1316_v7 }
 0x182   : > { %2315 = vmatmul.msk.f32.gmra.mxu3 %vm1273_vm3, %v1465_v34 }
 0x187   : > { %v1548_v44 = vld [vmem:[#allocation3 + $0x80] sm:$0xff] }
 0x188   : > { %2326 = vmatmul.msk.f32.vlgmr.msrb.gmra.mxu1 %vm1273_vm3, %v3061_v59  ;;  %v1631_v59 = vld [vmem:[#allocation3 + $0x81] sm:$0xff] }
 0x189   : > { %2335 = vmatmul.msk.f32.vlgmr.msra.gmra.mxu2 %vm1273_vm3, %v3063_v27  ;;  %2324 = vmatmul.msk.f32.gmra.mxu0 %vm1273_vm3, %v1548_v44  ;;  %v1714_v27 = vld [vmem:[#allocation3 + $0x82] sm:$0xff] }
 0x18a   : > { %2344 = vmatmul.msk.f32.vlgmr.msra.gmra.mxu3 %vm1273_vm3, %v3080_v18  ;;  %v1881_v18 = vld [vmem:[#allocation3 + $0x91] sm:$0xff] }
 0x190   : > { %2327 = vmatmul.msk.f32.gmra.mxu1 %vm1273_vm3, %v3078_v16 }
 0x191   : > { %2336 = vmatmul.msk.f32.gmra.mxu2 %vm1273_vm3, %v3082_v31  ;;  %2353 = vmatmul.msk.f32.vlgmr.msra.gmra.mxu0 %vm1273_vm3, %v3078_v16  ;;  %v1369_v16 = vpop.f32.mrf.mxu1 }
 0x192   : > { %2345 = vmatmul.msk.f32.gmra.mxu3 %vm1273_vm3, %v3101_v38  ;;  %v1435_v2 = vadd.f32 %v1434_v23, %v1369_v16 }
 0x194   : > { %v1533_v19 = vadd.f32 %v1509_v47, %v1435_v2 }
 0x198   : > { %2328 = vmatmul.msk.f32.gmra.mxu1 %vm1273_vm3, %v3099_v42 }
 0x199   : > { %2337 = vmatmul.msk.f32.gmra.mxu2 %vm1273_vm3, %v3103_v43  ;;  %2354 = vmatmul.msk.f32.gmra.mxu0 %vm1273_vm3, %v3099_v42 }
 0x19a   : > { %2346 = vmatmul.msk.f32.gmra.mxu3 %vm1273_vm3, %v3131_v45 }
 0x1a0   : > { %2329 = vmatmul.msk.f32.gmra.mxu1 %vm1273_vm3, %v3129_v55 }
 0x1a1   : > { %2338 = vmatmul.msk.f32.gmra.mxu2 %vm1273_vm3, %v3133_v54  ;;  %2355 = vmatmul.msk.f32.gmra.mxu0 %vm1273_vm3, %v3129_v55 }
 0x1a2   : > { %2347 = vmatmul.msk.f32.gmra.mxu3 %vm1273_vm3, %v1314_v11 }
 0x1a8   : > { %2330 = vmatmul.msk.f32.gmra.mxu1 %vm1273_vm3, %v1323_v9 }
 0x1a9   : > { %2339 = vmatmul.msk.f32.gmra.mxu2 %vm1273_vm3, %v3150_v1  ;;  %2356 = vmatmul.msk.f32.gmra.mxu0 %vm1273_vm3, %v1323_v9 }
 0x1aa   : > { %2348 = vmatmul.msk.f32.gmra.mxu3 %vm1273_vm3, %v1315_v17 }
 0x1b0   : > { %2331 = vmatmul.msk.f32.gmra.mxu1 %vm1273_vm3, %v1324_v28 }
 0x1b1   : > { %2340 = vmatmul.msk.f32.gmra.mxu2 %vm1273_vm3, %v3159_v22  ;;  %2357 = vmatmul.msk.f32.gmra.mxu0 %vm1273_vm3, %v1324_v28 }
 0x1b2   : > { %2349 = vmatmul.msk.f32.gmra.mxu3 %vm1273_vm3, %v1316_v7 }
 0x1b8   : > { %2332 = vmatmul.msk.f32.gmra.mxu1 %vm1273_vm3, %v1325_v6 }
 0x1b9   : > { %2341 = vmatmul.msk.f32.gmra.mxu2 %vm1273_vm3, %v1465_v34  ;;  %2358 = vmatmul.msk.f32.gmra.mxu0 %vm1273_vm3, %v1325_v6 }
 0x1ba   : > { %2350 = vmatmul.msk.f32.gmra.mxu3 %vm1273_vm3, %v1548_v44 }
 0x1c0   : > { %2333 = vmatmul.msk.f32.gmra.mxu1 %vm1273_vm3, %v1631_v59 }
 0x1c1   : > { %2342 = vmatmul.msk.f32.gmra.mxu2 %vm1273_vm3, %v1714_v27  ;;  %2359 = vmatmul.msk.f32.gmra.mxu0 %vm1273_vm3, %v1631_v59 }
 0x1c2   : > { %2351 = vmatmul.msk.f32.gmra.mxu3 %vm1273_vm3, %v1798_v14 }
 0x1c8   : > { %2362 = vmatmul.msk.f32.vlgmr.msra.gmra.mxu1 %vm1273_vm3, %v3082_v31 }
 0x1c9   : > { %2360 = vmatmul.msk.f32.gmra.mxu0 %vm1273_vm3, %v1881_v18 }
 0x1cd   : > { %v1372_v42 = vpop.f32.mrf.mxu1 }
 0x1ce   : > { %v1592_v48 = vpop.f32.mrf.mxu0 }
 0x1cf   : > { %v1616_v20 = vadd.f32 %v1592_v48, %v1533_v19 }
 0x1d0   : > { %2363 = vmatmul.msk.f32.gmra.mxu1 %vm1273_vm3, %v3103_v43 }
 0x1d4   : > { %v1437_v10 = vpop.f32.mrf.mxu2 }
 0x1d5   : > { %v1375_v38 = vpop.f32.mrf.mxu1  ;;  %v1512_v36 = vpop.f32.mrf.mxu3  ;;  %v1438_v4 = vadd.f32 %v1437_v10, %v1372_v42 }
 0x1d6   : > { %v1595_v50 = vpop.f32.mrf.mxu0 }
 0x1d7   : > { %v1534_v17 = vadd.f32 %v1512_v36, %v1438_v4 }
 0x1d8   : > { %2364 = vmatmul.msk.f32.gmra.mxu1 %vm1273_vm3, %v3133_v54 }
 0x1d9   : > { %v1617_v40 = vadd.f32 %v1595_v50, %v1534_v17 }
 0x1dc   : > { %v1440_v21 = vpop.f32.mrf.mxu2 }
 0x1dd   : > { %v3228_v46 = vpop.f32.mrf.mxu1  ;;  %v1515_v26 = vpop.f32.mrf.mxu3  ;;  %v1441_v6 = vadd.f32 %v1440_v21, %v1375_v38 }
 0x1de   : > { %v1598_v52 = vpop.f32.mrf.mxu0 }
 0x1df   : > { %v1535_v44 = vadd.f32 %v1515_v26, %v1441_v6 }
 0x1e0   : > { %2365 = vmatmul.msk.f32.gmra.mxu1 %vm1273_vm3, %v3150_v1 }
 0x1e1   : > { %v1618_v23 = vadd.f32 %v1598_v52, %v1535_v44 }
 0x1e4   : > { %v1443_v57 = vpop.f32.mrf.mxu2 }
 0x1e5   : > { %v3232_v31 = vpop.f32.mrf.mxu1  ;;  %v1518_v55 = vpop.f32.mrf.mxu3  ;;  %v1444_v47 = vadd.f32 %v1443_v57, %v3228_v46 }
 0x1e6   : > { %v3245_v45 = vpop.f32.mrf.mxu0 }
 0x1e7   : > { %v1536_v26 = vadd.f32 %v1518_v55, %v1444_v47 }
 0x1e8   : > { %2366 = vmatmul.msk.f32.gmra.mxu1 %vm1273_vm3, %v3159_v22 }
 0x1ec   : > { %v3247_v54 = vpop.f32.mrf.mxu2 }
 0x1ed   : > { %v3236_v43 = vpop.f32.mrf.mxu1  ;;  %v3249_v13 = vpop.f32.mrf.mxu3 }
 0x1ee   : > { %v3251_v41 = vpop.f32.mrf.mxu0 }
 0x1f0   : > { %2367 = vmatmul.msk.f32.gmra.mxu1 %vm1273_vm3, %v1465_v34 }
 0x1f4   : > { %v3253_v53 = vpop.f32.mrf.mxu2 }
 0x1f5   : > { %v3239_v51 = vpop.f32.mrf.mxu1  ;;  %v3255_v25 = vpop.f32.mrf.mxu3 }
 0x1f6   : > { %v3257_v61 = vpop.f32.mrf.mxu0 }
 0x1f8   : > { %2368 = vmatmul.msk.f32.gmra.mxu1 %vm1273_vm3, %v1714_v27  ;;  %v3282_v27 = vld [vmem:[%s3372_s4] ss:$0 sm:$0xff] }
 0x1fc   : > { %v3259_v62 = vpop.f32.mrf.mxu2 }
 0x1fd   : > { %v3242_v58 = vpop.f32.mrf.mxu1  ;;  %v3261_v63 = vpop.f32.mrf.mxu3 }
 0x1fe   : > { %v3263_v5 = vpop.f32.mrf.mxu0 }
 0x200   : > { %2369 = vmatmul.msk.f32.gmra.mxu1 %vm1273_vm3, %v1964_v35 }
 0x204   : > { %v3265_v8 = vpop.f32.mrf.mxu2 }
 0x205   : > { %v1675_v12 = vpop.f32.mrf.mxu1  ;;  %v3269_v11 = vpop.f32.mrf.mxu3 }
 0x206   : > { %v3271_v1 = vpop.f32.mrf.mxu0  ;;  %v1699_v24 = vadd.f32 %v1675_v12, %v1616_v20 }
 0x20c   : > { %v1758_v15 = vpop.f32.mrf.mxu2 }
 0x20d   : > { %v1678_v60 = vpop.f32.mrf.mxu1  ;;  %v1842_v49 = vpop.f32.mrf.mxu3  ;;  %v1782_v22 = vadd.f32 %v1758_v15, %v1699_v24  ;;  %v1619_v15 = vadd.f32 %v3245_v45, %v1536_v26 }
 0x20e   : > { %v1925_v3 = vpop.f32.mrf.mxu0  ;;  %v1700_v34 = vadd.f32 %v1678_v60, %v1617_v40 }
 0x20f   : > { %v1866_v7 = vadd.f32 %v1842_v49, %v1782_v22 }
 0x211   : > { %v1949_v14 = vadd.f32 %v1925_v3, %v1866_v7 }
 0x214   : > { %v1761_v29 = vpop.f32.mrf.mxu2 }
 0x215   : > { %v1681_v30 = vpop.f32.mrf.mxu1  ;;  %v1845_v28 = vpop.f32.mrf.mxu3  ;;  %v1783_v59 = vadd.f32 %v1761_v29, %v1700_v34 }
 0x216   : > { %v1928_v33 = vpop.f32.mrf.mxu0  ;;  %v1701_v50 = vadd.f32 %v1681_v30, %v1618_v23  ;;  %v1447_v30 = vadd.f32 %v3247_v54, %v3232_v31  ;;  %v1450_v54 = vadd.f32 %v3253_v53, %v3236_v43 }
 0x217   : > { %v1867_v48 = vadd.f32 %v1845_v28, %v1783_v59  ;;  %v1453_v59 = vadd.f32 %v3259_v62, %v3239_v51 }
 0x218   : > { %v1537_v20 = vadd.f32 %v3249_v13, %v1447_v30  ;;  %v1538_v40 = vadd.f32 %v3255_v25, %v1450_v54 }
 0x219   : > { %v1950_v35 = vadd.f32 %v1928_v33, %v1867_v48  ;;  %v1539_v23 = vadd.f32 %v3261_v63, %v1453_v59 }
 0x21a   : > { %v1620_v31 = vadd.f32 %v3251_v41, %v1537_v20  ;;  %v1621_v53 = vadd.f32 %v3257_v61, %v1538_v40 }
 0x21b   : > { %v1622_v62 = vadd.f32 %v3263_v5, %v1539_v23 }
 0x21c   : > { %v1764_v39 = vpop.f32.mrf.mxu2 }
 0x21d   : > { %v1684_v0 = vpop.f32.mrf.mxu1  ;;  %v1848_v16 = vpop.f32.mrf.mxu3  ;;  %v1784_v12 = vadd.f32 %v1764_v39, %v1701_v50 }
 0x21e   : > { %v1931_v10 = vpop.f32.mrf.mxu0  ;;  %v1702_v2 = vadd.f32 %v1684_v0, %v1619_v15 }
 0x21f   : > { %v1868_v49 = vadd.f32 %v1848_v16, %v1784_v12 }
 0x221   : > { %v1951_v4 = vadd.f32 %v1931_v10, %v1868_v49 }
 0x224   : > { %v1767_v36 = vpop.f32.mrf.mxu2 }
 0x225   : > { %v3267_v9 = vpop.f32.mrf.mxu1  ;;  %v1851_v57 = vpop.f32.mrf.mxu3  ;;  %v1785_v24 = vadd.f32 %v1767_v36, %v1702_v2 }
 0x226   : > { %v1934_v3 = vpop.f32.mrf.mxu0  ;;  %v1703_v39 = vadd.f32 %v3267_v9, %v1620_v31 }
 0x227   : > { %v1869_v0 = vadd.f32 %v1851_v57, %v1785_v24 }
 0x229   : > { %v1952_v6 = vadd.f32 %v1934_v3, %v1869_v0 }
 0x22c   : > { %v1770_v19 = vpop.f32.mrf.mxu2 }
 0x22d   : > { %v3273_v56 = vpop.f32.mrf.mxu1  ;;  %v1854_v33 = vpop.f32.mrf.mxu3  ;;  %v1786_v7 = vadd.f32 %v1770_v19, %v1703_v39 }
 0x22e   : > { %v1937_v34 = vpop.f32.mrf.mxu0  ;;  %v1704_v25 = vadd.f32 %v3273_v56, %v1621_v53  ;;  %v1456_v56 = vadd.f32 %v3265_v8, %v3242_v58 }
 0x22f   : > { %v1870_v9 = vadd.f32 %v1854_v33, %v1786_v7 }
 0x231   : > { %v1953_v47 = vadd.f32 %v1937_v34, %v1870_v9 }
 0x235   : > { %v3275_v37 = vpop.f32.mrf.mxu1 }
 0x236   : > { %v1940_v36 = vpop.f32.mrf.mxu0  ;;  %v1705_v63 = vadd.f32 %v3275_v37, %v1622_v62 }
 0x23d   : > { %v3277_v32 = vpop.f32.mrf.mxu1 }
 0x23e   : > { %v1943_v37 = vpop.f32.mrf.mxu0 }
 0x245   : > { %v2008_v18 = vpop.f32.mrf.mxu1 }
 0x246   : > { %v2032_v42 = vadd.f32 %v2008_v18, %v1949_v14  ;;  %v1773_v14 = vpop.f32.mrf.mxu2  ;;  %v1946_v24 = vpop.f32.mrf.mxu0 }
 0x247   : > { %v1787_v48 = vadd.f32 %v1773_v14, %v1704_v25 }
 0x248   : > { %v2044_v38 = vadd.f32 %v3282_v27, %v2032_v42  ;;  %v1857_v42 = vpop.f32.mrf.mxu3 }
 0x249   : > { %v1871_v50 = vadd.f32 %v1857_v42, %v1787_v48 }
 0x24a   : > { %vm2052_vm13 = vcmp.gt.f32.partialorder %v2044_v38, 0.0  ;;  %v2060_v21 = vmul.f32 0.01, %v2044_v38 }
 0x24b   : > { %v1954_v12 = vadd.f32 %v1940_v36, %v1871_v50 }
 0x24c   : > { %v2068_v60 = vsel %vm2052_vm13, %v2044_v38, %v2060_v21 }
 0x24d   : > { %2076 = vst.msk [vmem:[%s3287_s10] sm:$0xff] %vm1273_vm3, %v2068_v60  ;;  %v2011_v52 = vpop.f32.mrf.mxu1 }
 0x24e   : > { %v2033_v46 = vadd.f32 %v2011_v52, %v1950_v35  ;;  %v1776_v51 = vpop.f32.mrf.mxu2  ;;  %v1540_v35 = vadd.f32 %v3269_v11, %v1456_v56 }
 0x24f   : > { %v1788_v60 = vadd.f32 %v1776_v51, %v1705_v63 }
 0x250   : > { %v2045_v55 = vadd.f32 %v3282_v27, %v2033_v46  ;;  %v1860_v46 = vpop.f32.mrf.mxu3  ;;  %v1623_v58 = vadd.f32 %v3271_v1, %v1540_v35 }
 0x251   : > { %v1872_v8 = vadd.f32 %v1860_v46, %v1788_v60 }
 0x252   : > { %vm2053_vm14 = vcmp.gt.f32.partialorder %v2045_v55, 0.0  ;;  %v2061_v29 = vmul.f32 0.01, %v2045_v55  ;;  %v1706_v49 = vadd.f32 %v3277_v32, %v1623_v58 }
 0x254   : > { %v2069_v28 = vsel %vm2053_vm14, %v2045_v55, %v2061_v29  ;;  %v1955_v55 = vadd.f32 %v1943_v37, %v1872_v8 }
 0x255   : > { %2077 = vst.msk [vmem:[%s3287_s10 + $0x8] sm:$0xff] %vm1273_vm3, %v2069_v28  ;;  %v2014_v17 = vpop.f32.mrf.mxu1 }
 0x256   : > { %v2034_v45 = vadd.f32 %v2014_v17, %v1951_v4  ;;  %v1779_v30 = vpop.f32.mrf.mxu2 }
 0x257   : > { %v1789_v2 = vadd.f32 %v1779_v30, %v1706_v49 }
 0x258   : > { %v2046_v22 = vadd.f32 %v3282_v27, %v2034_v45  ;;  %v1863_v29 = vpop.f32.mrf.mxu3 }
 0x259   : > { %v1873_v20 = vadd.f32 %v1863_v29, %v1789_v2 }
 0x25a   : > { %vm2054_vm15 = vcmp.gt.f32.partialorder %v2046_v22, 0.0  ;;  %v2062_v13 = vmul.f32 0.01, %v2046_v22 }
 0x25b   : > { %v1956_v28 = vadd.f32 %v1946_v24, %v1873_v20 }
 0x25c   : > { %v2070_v44 = vsel %vm2054_vm15, %v2046_v22, %v2062_v13 }
 0x25d   : > { %2078 = vst.msk [vmem:[%s3287_s10 + $0x10] sm:$0xff] %vm1273_vm3, %v2070_v44  ;;  %v2017_v41 = vpop.f32.mrf.mxu1 }
 0x25e   : > { %v2035_v43 = vadd.f32 %v2017_v41, %v1952_v6 }
 0x260   : > { %v2047_v16 = vadd.f32 %v3282_v27, %v2035_v43 }
 0x262   : > { %vm2055_vm0 = vcmp.gt.f32.partialorder %v2047_v16, 0.0  ;;  %v2063_v18 = vmul.f32 0.01, %v2047_v16 }
 0x264   : > { %v2071_v10 = vsel %vm2055_vm0, %v2047_v16, %v2063_v18 }
 0x265   : > { %2079 = vst.msk [vmem:[%s3287_s10 + $0x18] sm:$0xff] %vm1273_vm3, %v2071_v10  ;;  %v2020_v38 = vpop.f32.mrf.mxu1 }
 0x266   : > { %v2036_v61 = vadd.f32 %v2020_v38, %v1953_v47 }
 0x268   : > { %v2048_v21 = vadd.f32 %v3282_v27, %v2036_v61 }
 0x26a   : > { %vm2056_vm1 = vcmp.gt.f32.partialorder %v2048_v21, 0.0  ;;  %v2064_v26 = vmul.f32 0.01, %v2048_v21 }
 0x26c   : > { %v2072_v52 = vsel %vm2056_vm1, %v2048_v21, %v2064_v26 }
 0x26d   : > { %2080 = vst.msk [vmem:[%s3287_s10 + $0x20] sm:$0xff] %vm1273_vm3, %v2072_v52  ;;  %v2023_v5 = vpop.f32.mrf.mxu1 }
 0x26e   : > { %v2037_v57 = vadd.f32 %v2023_v5, %v1954_v12 }
 0x270   : > { %v2049_v15 = vadd.f32 %v3282_v27, %v2037_v57 }
 0x272   : > { %vm2057_vm2 = vcmp.gt.f32.partialorder %v2049_v15, 0.0  ;;  %v2065_v11 = vmul.f32 0.01, %v2049_v15 }
 0x274   : > { %v2073_v3 = vsel %vm2057_vm2, %v2049_v15, %v2065_v11 }
 0x275   : > { %2081 = vst.msk [vmem:[%s3287_s10 + $0x28] sm:$0xff] %vm1273_vm3, %v2073_v3  ;;  %v2026_v19 = vpop.f32.mrf.mxu1 }
 0x276   : > { %v2038_v1 = vadd.f32 %v2026_v19, %v1955_v55 }
 0x278   : > { %v2050_v4 = vadd.f32 %v3282_v27, %v2038_v1 }
 0x27a   : > { %vm2058_vm4 = vcmp.gt.f32.partialorder %v2050_v4, 0.0  ;;  %v2066_v32 = vmul.f32 0.01, %v2050_v4 }
 0x27c   : > { %v2074_v17 = vsel %vm2058_vm4, %v2050_v4, %v2066_v32 }
 0x27d   : > { %2082 = vst.msk [vmem:[%s3287_s10 + $0x30] sm:$0xff] %vm1273_vm3, %v2074_v17  ;;  %v2029_v45 = vpop.f32.mrf.mxu1 }
 0x27e   : > { %v2039_v31 = vadd.f32 %v2029_v45, %v1956_v28 }
 0x280   : > { %v2051_v54 = vadd.f32 %v3282_v27, %v2039_v31 }
 0x282   : > { %vm2059_vm5 = vcmp.gt.f32.partialorder %v2051_v54, 0.0  ;;  %v2067_v0 = vmul.f32 0.01, %v2051_v54 }
 0x284   : > { %v2075_v22 = vsel %vm2059_vm5, %v2051_v54, %v2067_v0 }
 0x285   : > { %2083 = vst.msk [vmem:[%s3287_s10 + $0x38] sm:$0xff] %vm1273_vm3, %v2075_v22 }
 0x286   : > { %2450 = shalt.err (!%p2447_p5)
}
 0x287   : > { %s2488_s16 = smov 128   ;;  %s2489_s9 = smov 8  }
 0x288   : > { %2379 = dma.vmem_to_hbm [thread:$0]  (%p2558_p6), %s2098_s15, 1024, %s2100_s17, %s2085_s22, %s2488_s16, %s2488_s16, %s2489_s9  }
 0x289 PF: > { %s2114_s10 = sand.u32 1, %s2473_s18   ;;  %p2382_p7 = pnand %p2170_p9, %p2562_p8 }
 0x28a   : > { %s2115_s11 = scalar_lea.sflag [#allocation6], %s2114_s10 }
 0x28b   : > { %p2383_p10 = pneg %p2382_p7 }
 0x28d   : > { %2468 = dma.done.wait (%p2383_p10), %s2115_s11, 1024  }
 0x28e   : > { %2470 = vsyncadd (%p2383_p10), %s2115_s11, 4294966272  ;;  %p15_p11 = scmp.ge.s32.totalorder %s2543_s24, 4   ;;  %s3376_s18 = smov %s2477_s19 }
 0x28f   : > { %s3377_s19 = smov %s2481_s20  ;;  %s3378_s20 = smov %s2556_s27 }
 0x290   : > { %s3379_s21 = smov %s2543_s24  ;;  %17 = sbr.rel (!%p15_p11) target bundleno = 3 (0x3), region = 143 }
 0x295   :  { %2121 = vsyncpa [#allocation6], 1 }
 0x296   :  { %2123 = vsyncpa [#allocation6 + $0x1], 1 }

</bundles_post_ra>
